<compile_context>
chip_gen: v6e
topology: v6e:2x2x1
jax: 0.10.0
libtpu: 0.0.40
codegen_flags: <defaults>
</compile_context>

<pallas_src>
import functools

import jax
import jax.numpy as jnp
from jax import lax
from jax.experimental import pallas as pl
from jax.experimental.pallas import tpu as pltpu

EPS = 1e-12        # F.normalize eps
EPS2 = EPS * EPS   # guard applied to the squared norm (rsqrt form)


# ----------------------------------------------------------------------------
# Kernel A: im2col conv3x3 (SAME) + bias + ReLU, fused spatial-mean pooling
# ----------------------------------------------------------------------------
def _conv_relu_pool_kernel(x_ref, w_ref, b_ref, f_ref, pool_ref, *, img_block):
    """IMG_BLOCK images per grid step.

    x_ref   : (IMG_BLOCK, H*W, 9*Cin) im2col patch matrices.
    w_ref   : (9*Cin, Cout) tap-major (kh, kw, Cin) weights.
    b_ref   : (1, Cout)
    f_ref   : (IMG_BLOCK, H*W, Cout) ReLU feature maps (channels-last).
    pool_ref: (IMG_BLOCK, 1, Cout)   spatial means (fused epilogue).
    """
    w = w_ref[...]                                   # (9*Cin, Cout)
    b = b_ref[...]                                   # (1, Cout)
    # Statically-unrolled per-image loop: one K=27 MXU contraction per image,
    # live result bounded at (H*W, Cout) = 8 vregs for 64x128 f32.
    for i in range(img_block):
        acc = jnp.dot(x_ref[i], w, preferred_element_type=jnp.float32)
        f = jnp.maximum(acc + b, 0.0)                # (H*W, Cout)
        f_ref[i] = f
        pool_ref[i] = jnp.mean(f, axis=0, keepdims=True)


def conv3x3_relu_pool(x_nhwc, conv_w, conv_b, img_block=8):
    """x_nhwc: (N, H, W, Cin); conv_w: (Cout, Cin, 3, 3) OIHW; conv_b: (Cout,).

    Returns (f, f_pool): f (N, H*W, Cout) channels-last features,
    f_pool (N, 1, Cout) spatial means.
    """
    N, H, W, Cin = x_nhwc.shape
    Cout = conv_w.shape[0]
    K9 = 9 * Cin

    # im2col on the tiny raw input: (N, H, W, 9*Cin), tap-major (kh, kw, Cin).
    xpad = jnp.pad(x_nhwc, ((0, 0), (1, 1), (1, 1), (0, 0)))
    patches = jnp.concatenate(
        [xpad[:, kh:kh + H, kw:kw + W, :] for kh in range(3) for kw in range(3)],
        axis=-1).reshape(N, H * W, K9)

    # Pad the image axis so IMG_BLOCK images fit per grid step; padded images
    # are zero (ReLU(bias) garbage) and are sliced off below.
    img_block = min(img_block, max(N, 1))
    n_pad = pl.cdiv(N, img_block) * img_block
    if n_pad != N:
        patches = jnp.pad(patches, ((0, n_pad - N), (0, 0), (0, 0)))

    w27 = jnp.transpose(conv_w, (2, 3, 1, 0)).reshape(K9, Cout)   # (kh,kw,Cin)->rows
    b_row = conv_b.reshape(1, Cout)

    kernel = functools.partial(_conv_relu_pool_kernel, img_block=img_block)
    f, pool = pl.pallas_call(
        kernel,
        out_shape=(jax.ShapeDtypeStruct((n_pad, H * W, Cout), jnp.float32),
                   jax.ShapeDtypeStruct((n_pad, 1, Cout), jnp.float32)),
        grid_spec=pltpu.PrefetchScalarGridSpec(
            num_scalar_prefetch=0,
            grid=(n_pad // img_block,),
            in_specs=[
                pl.BlockSpec((img_block, H * W, K9), lambda i: (i, 0, 0)),
                pl.BlockSpec((K9, Cout), lambda i: (0, 0)),
                pl.BlockSpec((1, Cout), lambda i: (0, 0)),
            ],
            out_specs=[
                pl.BlockSpec((img_block, H * W, Cout), lambda i: (i, 0, 0)),
                pl.BlockSpec((img_block, 1, Cout), lambda i: (i, 0, 0)),
            ],
        ),
        compiler_params=pltpu.CompilerParams(dimension_semantics=("parallel",)),
    )(patches, w27, b_row)
    return f[:N], pool[:N]


# ----------------------------------------------------------------------------
# Kernel B: fused episode head (prototypes + classifier + spatial cosine scores)
# ----------------------------------------------------------------------------
def _episode_head_kernel(y_ref, ftr_ref, ftep_ref, xsp_ref, w_ref, b_ref,
                         pred_ref, score_ref, *, scale):
    """One episode (batch element) per grid step.

    y_ref    : (1, K, n_tr)       one-hot labels (transposed).
    ftr_ref  : (1, n_tr, Cf)      pooled train features.
    ftep_ref : (1, n_te, Cf)      pooled test features.
    xsp_ref  : (1, Cf, n_te*H*W)  spatial test features, PRE-TRANSPOSED so the
                                  kernel does (K,Cf)@(Cf,M) with no XLU xpose.
    w_ref    : (Cf, NC), b_ref: (1, NC)
    pred_ref : (1, n_te, NC)      classifier logits.
    score_ref: (1, K, n_te*H*W)   scaled cosine scores.
    """
    y = y_ref[0]                                                  # (K, n_tr)
    ftr = ftr_ref[0]                                              # (n_tr, Cf)

    # Class prototypes from pooled features (spatial mean commutes with the
    # label-weighted average; the (K, Cf*H*W) tensor is never built).
    counts = jnp.sum(y, axis=1, keepdims=True)                    # (K, 1)
    protos = jnp.dot(y, ftr, preferred_element_type=jnp.float32) / counts

    # Global classifier: normalize AFTER the matmul (same math, far fewer
    # VPU ops on the wide operand).
    fp = ftep_ref[0]                                              # (n_te, Cf)
    inv_fp = lax.rsqrt(jnp.maximum(
        jnp.sum(fp * fp, axis=1, keepdims=True), EPS2))           # (n_te, 1)
    logits = jnp.dot(fp, w_ref[...], preferred_element_type=jnp.float32)
    pred_ref[0] = logits * inv_fp + b_ref[...]

    # Spatial cosine scores: scale * <protos/|protos|, x/|x|> for every test
    # spatial position; 1/|x| is applied to the small (K, M) result instead of
    # the (Cf, M) operand.
    inv_p = lax.rsqrt(jnp.maximum(
        jnp.sum(protos * protos, axis=1, keepdims=True), EPS2))   # (K, 1)
    pn = protos * inv_p                                           # (K, Cf)
    xsp = xsp_ref[0]                                              # (Cf, M)
    raw = jnp.dot(pn, xsp, preferred_element_type=jnp.float32)    # (K, M)
    ssx = jnp.sum(xsp * xsp, axis=0, keepdims=True)               # (1, M)
    score_ref[0] = scale * raw * lax.rsqrt(jnp.maximum(ssx, EPS2))


def episode_head(ytrain_t, ftrain_pool, ftest_pool, ftest_sp_t, cls_w, cls_b,
                 scale_cls):
    B, K, n_tr = ytrain_t.shape
    _, Cf, M = ftest_sp_t.shape        # M = n_te * H * W
    n_te = ftest_pool.shape[1]
    NC = cls_w.shape[1]

    kernel = functools.partial(_episode_head_kernel, scale=float(scale_cls))
    return pl.pallas_call(
        kernel,
        out_shape=(jax.ShapeDtypeStruct((B, n_te, NC), jnp.float32),
                   jax.ShapeDtypeStruct((B, K, M), jnp.float32)),
        grid_spec=pltpu.PrefetchScalarGridSpec(
            num_scalar_prefetch=0,
            grid=(B,),
            in_specs=[
                pl.BlockSpec((1, K, n_tr), lambda b: (b, 0, 0)),
                pl.BlockSpec((1, n_tr, Cf), lambda b: (b, 0, 0)),
                pl.BlockSpec((1, n_te, Cf), lambda b: (b, 0, 0)),
                pl.BlockSpec((1, Cf, M), lambda b: (b, 0, 0)),
                pl.BlockSpec((Cf, NC), lambda b: (0, 0)),
                pl.BlockSpec((1, NC), lambda b: (0, 0)),
            ],
            out_specs=[
                pl.BlockSpec((1, n_te, NC), lambda b: (b, 0, 0)),
                pl.BlockSpec((1, K, M), lambda b: (b, 0, 0)),
            ],
        ),
        compiler_params=pltpu.CompilerParams(dimension_semantics=("parallel",)),
    )(ytrain_t, ftrain_pool, ftest_pool, ftest_sp_t, cls_w, cls_b.reshape(1, NC))


# ----------------------------------------------------------------------------
# Full forward (training branch of Model.forward); inputs follow the NCHW spec
# ----------------------------------------------------------------------------
def model_forward(xtrain, xtest, ytrain, ytest, params, scale_cls=1.0):
    del ytest  # unused by the reference forward
    B, n_tr, Cin, H, W = xtrain.shape
    n_te = xtest.shape[1]
    K = ytrain.shape[2]

    ytrain_t = jnp.transpose(ytrain, (0, 2, 1))                   # (B, K, n_tr)
    x = jnp.concatenate([xtrain.reshape(-1, Cin, H, W),
                         xtest.reshape(-1, Cin, H, W)], axis=0)
    x_nhwc = jnp.transpose(x, (0, 2, 3, 1))                       # channels-last

    f, f_pool = conv3x3_relu_pool(x_nhwc, params["conv_w"], params["conv_b"])
    Cf = f.shape[-1]
    n_train_imgs = B * n_tr

    ftrain_pool = f_pool[:n_train_imgs].reshape(B, n_tr, Cf)
    ftest_pool = f_pool[n_train_imgs:].reshape(B, n_te, Cf)
    # Pre-transpose the spatial test features to (B, Cf, M) in the wrapper
    # (cheap XLA pass) so Kernel B never transposes the large operand.
    ftest_sp_t = jnp.transpose(
        f[n_train_imgs:].reshape(B, n_te * H * W, Cf), (0, 2, 1))  # (B, Cf, M)

    predict, scores = episode_head(ytrain_t, ftrain_pool, ftest_pool,
                                   ftest_sp_t, params["cls_w"], params["cls_b"],
                                   scale_cls)

    predict_test = predict.reshape(B * n_te, -1)
    cls_scores = jnp.transpose(scores.reshape(B, K, n_te, H, W),
                               (0, 2, 1, 3, 4)).reshape(B * n_te, K, H, W)
    return predict_test, cls_scores


# ----------------------------------------------------------------------------
# Pure-JAX reference (mirrors the PyTorch math) for validation
# ----------------------------------------------------------------------------
def reference_forward(xtrain, xtest, ytrain, ytest, params, scale_cls=1.0):
    del ytest
    B, n_tr, Cin, H, W = xtrain.shape
    n_te = xtest.shape[1]
    ytrain_t = jnp.transpose(ytrain, (0, 2, 1))
    x = jnp.concatenate([xtrain.reshape(-1, Cin, H, W),
                         xtest.reshape(-1, Cin, H, W)], axis=0)
    f = lax.conv_general_dilated(x, params["conv_w"], (1, 1), "SAME",
                                 dimension_numbers=("NCHW", "OIHW", "NCHW"))
    f = jnp.maximum(f + params["conv_b"][None, :, None, None], 0.0)
    Cf = f.shape[1]

    ftrain = f[:B * n_tr].reshape(B, n_tr, -1)
    protos = jnp.einsum("bkn,bnd->bkd", ytrain_t, ftrain)
    protos = protos / jnp.sum(ytrain_t, axis=2, keepdims=True)
    protos = protos.reshape(B, -1, Cf, H, W)
    ftest = f[B * n_tr:].reshape(B, n_te, Cf, H, W)

    f_test = ftest.mean(axis=(3, 4)).reshape(B * n_te, Cf)
    f_test = f_test / jnp.maximum(
        jnp.linalg.norm(f_test, axis=-1, keepdims=True), EPS)
    predict_test = f_test @ params["cls_w"] + params["cls_b"]

    proto_mean = protos.mean(axis=(3, 4))
    pm_n = proto_mean / jnp.maximum(
        jnp.linalg.norm(proto_mean, axis=-1, keepdims=True), EPS)
    ft = ftest.reshape(B, n_te, Cf, H * W)
    ft_n = ft / jnp.maximum(jnp.sqrt(jnp.sum(ft * ft, axis=2, keepdims=True)), EPS)
    cls = scale_cls * jnp.einsum("bkc,bncs->bnks", pm_n, ft_n)
    cls = cls.reshape(B * n_te, -1, H, W)
    return predict_test, cls


if __name__ == "__main__":
    # small shapes: batch=2, num_train=4 (2-way episode), num_test=3,
    # images 3x8x8, backbone channels=128 (lane-dense), classifier classes=64
    B, N_TRAIN, N_TEST, K_WAY = 2, 4, 3, 2
    CIN, H, W = 3, 8, 8
    CF, NUM_CLASSES = 128, 64

    key = jax.random.PRNGKey(0)
    k1, k2, k3, k4, k5, k6 = jax.random.split(key, 6)

    params = {
        "conv_w": 0.1 * jax.random.normal(k1, (CF, CIN, 3, 3), jnp.float32),
        "conv_b": 0.05 * jax.random.normal(k2, (CF,), jnp.float32),
        "cls_w": 0.1 * jax.random.normal(k3, (CF, NUM_CLASSES), jnp.float32),
        "cls_b": 0.05 * jax.random.normal(k4, (NUM_CLASSES,), jnp.float32),
    }

    xtrain = jax.random.normal(k5, (B, N_TRAIN, CIN, H, W), jnp.float32)
    xtest = jax.random.normal(k6, (B, N_TEST, CIN, H, W), jnp.float32)
    labels_train = jnp.array([[0, 1, 0, 1], [1, 0, 1, 0]], jnp.int32)
    ytrain = jax.nn.one_hot(labels_train, K_WAY, dtype=jnp.float32)  # (B, n_tr, K)
    ytest = jnp.zeros((B, N_TEST, K_WAY), jnp.float32)               # unused

    fwd = jax.jit(model_forward)
    predict_test, cls_scores = fwd(xtrain, xtest, ytrain, ytest, params)
    jax.block_until_ready((predict_test, cls_scores))

    ref_pred, ref_cls = reference_forward(xtrain, xtest, ytrain, ytest, params)
    assert predict_test.shape == (B * N_TEST, NUM_CLASSES)
    assert cls_scores.shape == (B * N_TEST, K_WAY, H, W)
    assert jnp.allclose(predict_test, ref_pred, rtol=1e-4, atol=1e-4), \
        float(jnp.max(jnp.abs(predict_test - ref_pred)))
    assert jnp.allclose(cls_scores, ref_cls, rtol=1e-4, atol=1e-4), \
        float(jnp.max(jnp.abs(cls_scores - ref_cls)))

    print("KERNEL_OK")
</pallas_src>

<mosaic_0001>
module attributes {stable_mosaic.version = 11 : i64} {
  func.func @_conv_relu_pool_kernel(%arg0: i32, %arg1: memref<8x64x27xf32, #tpu.memory_space<vmem>>, %arg2: memref<27x128xf32, #tpu.memory_space<vmem>>, %arg3: memref<1x128xf32, #tpu.memory_space<vmem>>, %arg4: memref<8x64x128xf32, #tpu.memory_space<vmem>>, %arg5: memref<8x1x128xf32, #tpu.memory_space<vmem>>) attributes {dimension_semantics = [#tpu.dimension_semantics<parallel>], iteration_bounds = array<i64: 2>, scalar_prefetch = 0 : i64, scratch_operands = 0 : i64, tpu.core_type = #tpu.core_type<tc>, window_params = [{transform_indices = @transform_0, window_bounds = array<i64: 8, 64, 27>}, {pipeline_mode = #tpu.pipeline_mode<synchronous>, transform_indices = @transform_1, window_bounds = array<i64: 27, 128>}, {pipeline_mode = #tpu.pipeline_mode<synchronous>, transform_indices = @transform_2, window_bounds = array<i64: 1, 128>}, {transform_indices = @transform_3, window_bounds = array<i64: 8, 64, 128>}, {transform_indices = @transform_4, window_bounds = array<i64: 8, 1, 128>}]} {
    %c0 = arith.constant 0 : index
    %c0_0 = arith.constant 0 : index
    %0 = vector.load %arg2[%c0, %c0_0] : memref<27x128xf32, #tpu.memory_space<vmem>>, vector<27x128xf32>
    %c0_1 = arith.constant 0 : index
    %c0_2 = arith.constant 0 : index
    %1 = vector.load %arg3[%c0_1, %c0_2] : memref<1x128xf32, #tpu.memory_space<vmem>>, vector<1x128xf32>
    %c0_3 = arith.constant 0 : index
    %c0_4 = arith.constant 0 : index
    %c0_5 = arith.constant 0 : index
    %2 = vector.load %arg1[%c0_3, %c0_4, %c0_5] : memref<8x64x27xf32, #tpu.memory_space<vmem>>, vector<1x64x27xf32>
    %3 = vector.shape_cast %2 : vector<1x64x27xf32> to vector<64x27xf32>
    %cst = arith.constant dense<0.000000e+00> : vector<64x128xf32>
    %4 = tpu.matmul %3, %0, %cst {dimension_numbers = #tpu.dot_dimension_numbers<[1], [0], [0], [1], [0, 0, 1, 1], [], []>} : vector<64x27xf32>, vector<27x128xf32>, vector<64x128xf32> -> vector<64x128xf32>
    %5 = vector.broadcast %1 : vector<1x128xf32> to vector<64x128xf32>
    %6 = arith.addf %4, %5 : vector<64x128xf32>
    %cst_6 = arith.constant 0.000000e+00 : f32
    %7 = vector.broadcast %cst_6 : f32 to vector<64x128xf32>
    %8 = arith.maximumf %6, %7 : vector<64x128xf32>
    %c0_7 = arith.constant 0 : index
    %c0_8 = arith.constant 0 : index
    %c0_9 = arith.constant 0 : index
    %9 = vector.load %arg4[%c0_7, %c0_8, %c0_9] : memref<8x64x128xf32, #tpu.memory_space<vmem>>, vector<1x64x128xf32>
    %10 = vector.shape_cast %9 : vector<1x64x128xf32> to vector<64x128xf32>
    %11 = vector.shape_cast %8 : vector<64x128xf32> to vector<1x64x128xf32>
    tpu.vector_store %arg4[%c0_7, %c0_8, %c0_9], %11 {strides = array<i32>} : memref<8x64x128xf32, #tpu.memory_space<vmem>>, vector<1x64x128xf32>,
    %cst_10 = arith.constant dense<0.000000e+00> : vector<128xf32>
    %12 = vector.multi_reduction <add>, %8, %cst_10 [0] : vector<64x128xf32> to vector<128xf32>
    %13 = vector.shape_cast %12 : vector<128xf32> to vector<1x128xf32>
    %cst_11 = arith.constant 6.400000e+01 : f32
    %14 = vector.broadcast %cst_11 : f32 to vector<1x128xf32>
    %15 = arith.divf %13, %14 : vector<1x128xf32>
    %c0_12 = arith.constant 0 : index
    %c0_13 = arith.constant 0 : index
    %c0_14 = arith.constant 0 : index
    %16 = vector.load %arg5[%c0_12, %c0_13, %c0_14] : memref<8x1x128xf32, #tpu.memory_space<vmem>>, vector<1x1x128xf32>
    %17 = vector.shape_cast %16 : vector<1x1x128xf32> to vector<1x128xf32>
    %18 = vector.shape_cast %15 : vector<1x128xf32> to vector<1x1x128xf32>
    tpu.vector_store %arg5[%c0_12, %c0_13, %c0_14], %18 {strides = array<i32>} : memref<8x1x128xf32, #tpu.memory_space<vmem>>, vector<1x1x128xf32>,
    %c1 = arith.constant 1 : index
    %c0_15 = arith.constant 0 : index
    %c0_16 = arith.constant 0 : index
    %19 = vector.load %arg1[%c1, %c0_15, %c0_16] : memref<8x64x27xf32, #tpu.memory_space<vmem>>, vector<1x64x27xf32>
    %20 = vector.shape_cast %19 : vector<1x64x27xf32> to vector<64x27xf32>
    %cst_17 = arith.constant dense<0.000000e+00> : vector<64x128xf32>
    %21 = tpu.matmul %20, %0, %cst_17 {dimension_numbers = #tpu.dot_dimension_numbers<[1], [0], [0], [1], [0, 0, 1, 1], [], []>} : vector<64x27xf32>, vector<27x128xf32>, vector<64x128xf32> -> vector<64x128xf32>
    %22 = vector.broadcast %1 : vector<1x128xf32> to vector<64x128xf32>
    %23 = arith.addf %21, %22 : vector<64x128xf32>
    %cst_18 = arith.constant 0.000000e+00 : f32
    %24 = vector.broadcast %cst_18 : f32 to vector<64x128xf32>
    %25 = arith.maximumf %23, %24 : vector<64x128xf32>
    %c1_19 = arith.constant 1 : index
    %c0_20 = arith.constant 0 : index
    %c0_21 = arith.constant 0 : index
    %26 = vector.load %arg4[%c1_19, %c0_20, %c0_21] : memref<8x64x128xf32, #tpu.memory_space<vmem>>, vector<1x64x128xf32>
    %27 = vector.shape_cast %26 : vector<1x64x128xf32> to vector<64x128xf32>
    %28 = vector.shape_cast %25 : vector<64x128xf32> to vector<1x64x128xf32>
    tpu.vector_store %arg4[%c1_19, %c0_20, %c0_21], %28 {strides = array<i32>} : memref<8x64x128xf32, #tpu.memory_space<vmem>>, vector<1x64x128xf32>,
    %cst_22 = arith.constant dense<0.000000e+00> : vector<128xf32>
    %29 = vector.multi_reduction <add>, %25, %cst_22 [0] : vector<64x128xf32> to vector<128xf32>
    %30 = vector.shape_cast %29 : vector<128xf32> to vector<1x128xf32>
    %cst_23 = arith.constant 6.400000e+01 : f32
    %31 = vector.broadcast %cst_23 : f32 to vector<1x128xf32>
    %32 = arith.divf %30, %31 : vector<1x128xf32>
    %c1_24 = arith.constant 1 : index
    %c0_25 = arith.constant 0 : index
    %c0_26 = arith.constant 0 : index
    %33 = vector.load %arg5[%c1_24, %c0_25, %c0_26] : memref<8x1x128xf32, #tpu.memory_space<vmem>>, vector<1x1x128xf32>
    %34 = vector.shape_cast %33 : vector<1x1x128xf32> to vector<1x128xf32>
    %35 = vector.shape_cast %32 : vector<1x128xf32> to vector<1x1x128xf32>
    tpu.vector_store %arg5[%c1_24, %c0_25, %c0_26], %35 {strides = array<i32>} : memref<8x1x128xf32, #tpu.memory_space<vmem>>, vector<1x1x128xf32>,
    %c2 = arith.constant 2 : index
    %c0_27 = arith.constant 0 : index
    %c0_28 = arith.constant 0 : index
    %36 = vector.load %arg1[%c2, %c0_27, %c0_28] : memref<8x64x27xf32, #tpu.memory_space<vmem>>, vector<1x64x27xf32>
    %37 = vector.shape_cast %36 : vector<1x64x27xf32> to vector<64x27xf32>
    %cst_29 = arith.constant dense<0.000000e+00> : vector<64x128xf32>
    %38 = tpu.matmul %37, %0, %cst_29 {dimension_numbers = #tpu.dot_dimension_numbers<[1], [0], [0], [1], [0, 0, 1, 1], [], []>} : vector<64x27xf32>, vector<27x128xf32>, vector<64x128xf32> -> vector<64x128xf32>
    %39 = vector.broadcast %1 : vector<1x128xf32> to vector<64x128xf32>
    %40 = arith.addf %38, %39 : vector<64x128xf32>
    %cst_30 = arith.constant 0.000000e+00 : f32
    %41 = vector.broadcast %cst_30 : f32 to vector<64x128xf32>
    %42 = arith.maximumf %40, %41 : vector<64x128xf32>
    %c2_31 = arith.constant 2 : index
    %c0_32 = arith.constant 0 : index
    %c0_33 = arith.constant 0 : index
    %43 = vector.load %arg4[%c2_31, %c0_32, %c0_33] : memref<8x64x128xf32, #tpu.memory_space<vmem>>, vector<1x64x128xf32>
    %44 = vector.shape_cast %43 : vector<1x64x128xf32> to vector<64x128xf32>
    %45 = vector.shape_cast %42 : vector<64x128xf32> to vector<1x64x128xf32>
    tpu.vector_store %arg4[%c2_31, %c0_32, %c0_33], %45 {strides = array<i32>} : memref<8x64x128xf32, #tpu.memory_space<vmem>>, vector<1x64x128xf32>,
    %cst_34 = arith.constant dense<0.000000e+00> : vector<128xf32>
    %46 = vector.multi_reduction <add>, %42, %cst_34 [0] : vector<64x128xf32> to vector<128xf32>
    %47 = vector.shape_cast %46 : vector<128xf32> to vector<1x128xf32>
    %cst_35 = arith.constant 6.400000e+01 : f32
    %48 = vector.broadcast %cst_35 : f32 to vector<1x128xf32>
    %49 = arith.divf %47, %48 : vector<1x128xf32>
    %c2_36 = arith.constant 2 : index
    %c0_37 = arith.constant 0 : index
    %c0_38 = arith.constant 0 : index
    %50 = vector.load %arg5[%c2_36, %c0_37, %c0_38] : memref<8x1x128xf32, #tpu.memory_space<vmem>>, vector<1x1x128xf32>
    %51 = vector.shape_cast %50 : vector<1x1x128xf32> to vector<1x128xf32>
    %52 = vector.shape_cast %49 : vector<1x128xf32> to vector<1x1x128xf32>
    tpu.vector_store %arg5[%c2_36, %c0_37, %c0_38], %52 {strides = array<i32>} : memref<8x1x128xf32, #tpu.memory_space<vmem>>, vector<1x1x128xf32>,
    %c3 = arith.constant 3 : index
    %c0_39 = arith.constant 0 : index
    %c0_40 = arith.constant 0 : index
    %53 = vector.load %arg1[%c3, %c0_39, %c0_40] : memref<8x64x27xf32, #tpu.memory_space<vmem>>, vector<1x64x27xf32>
    %54 = vector.shape_cast %53 : vector<1x64x27xf32> to vector<64x27xf32>
    %cst_41 = arith.constant dense<0.000000e+00> : vector<64x128xf32>
    %55 = tpu.matmul %54, %0, %cst_41 {dimension_numbers = #tpu.dot_dimension_numbers<[1], [0], [0], [1], [0, 0, 1, 1], [], []>} : vector<64x27xf32>, vector<27x128xf32>, vector<64x128xf32> -> vector<64x128xf32>
    %56 = vector.broadcast %1 : vector<1x128xf32> to vector<64x128xf32>
    %57 = arith.addf %55, %56 : vector<64x128xf32>
    %cst_42 = arith.constant 0.000000e+00 : f32
    %58 = vector.broadcast %cst_42 : f32 to vector<64x128xf32>
    %59 = arith.maximumf %57, %58 : vector<64x128xf32>
    %c3_43 = arith.constant 3 : index
    %c0_44 = arith.constant 0 : index
    %c0_45 = arith.constant 0 : index
    %60 = vector.load %arg4[%c3_43, %c0_44, %c0_45] : memref<8x64x128xf32, #tpu.memory_space<vmem>>, vector<1x64x128xf32>
    %61 = vector.shape_cast %60 : vector<1x64x128xf32> to vector<64x128xf32>
    %62 = vector.shape_cast %59 : vector<64x128xf32> to vector<1x64x128xf32>
    tpu.vector_store %arg4[%c3_43, %c0_44, %c0_45], %62 {strides = array<i32>} : memref<8x64x128xf32, #tpu.memory_space<vmem>>, vector<1x64x128xf32>,
    %cst_46 = arith.constant dense<0.000000e+00> : vector<128xf32>
    %63 = vector.multi_reduction <add>, %59, %cst_46 [0] : vector<64x128xf32> to vector<128xf32>
    %64 = vector.shape_cast %63 : vector<128xf32> to vector<1x128xf32>
    %cst_47 = arith.constant 6.400000e+01 : f32
    %65 = vector.broadcast %cst_47 : f32 to vector<1x128xf32>
    %66 = arith.divf %64, %65 : vector<1x128xf32>
    %c3_48 = arith.constant 3 : index
    %c0_49 = arith.constant 0 : index
    %c0_50 = arith.constant 0 : index
    %67 = vector.load %arg5[%c3_48, %c0_49, %c0_50] : memref<8x1x128xf32, #tpu.memory_space<vmem>>, vector<1x1x128xf32>
    %68 = vector.shape_cast %67 : vector<1x1x128xf32> to vector<1x128xf32>
    %69 = vector.shape_cast %66 : vector<1x128xf32> to vector<1x1x128xf32>
    tpu.vector_store %arg5[%c3_48, %c0_49, %c0_50], %69 {strides = array<i32>} : memref<8x1x128xf32, #tpu.memory_space<vmem>>, vector<1x1x128xf32>,
    %c4 = arith.constant 4 : index
    %c0_51 = arith.constant 0 : index
    %c0_52 = arith.constant 0 : index
    %70 = vector.load %arg1[%c4, %c0_51, %c0_52] : memref<8x64x27xf32, #tpu.memory_space<vmem>>, vector<1x64x27xf32>
    %71 = vector.shape_cast %70 : vector<1x64x27xf32> to vector<64x27xf32>
    %cst_53 = arith.constant dense<0.000000e+00> : vector<64x128xf32>
    %72 = tpu.matmul %71, %0, %cst_53 {dimension_numbers = #tpu.dot_dimension_numbers<[1], [0], [0], [1], [0, 0, 1, 1], [], []>} : vector<64x27xf32>, vector<27x128xf32>, vector<64x128xf32> -> vector<64x128xf32>
    %73 = vector.broadcast %1 : vector<1x128xf32> to vector<64x128xf32>
    %74 = arith.addf %72, %73 : vector<64x128xf32>
    %cst_54 = arith.constant 0.000000e+00 : f32
    %75 = vector.broadcast %cst_54 : f32 to vector<64x128xf32>
    %76 = arith.maximumf %74, %75 : vector<64x128xf32>
    %c4_55 = arith.constant 4 : index
    %c0_56 = arith.constant 0 : index
    %c0_57 = arith.constant 0 : index
    %77 = vector.load %arg4[%c4_55, %c0_56, %c0_57] : memref<8x64x128xf32, #tpu.memory_space<vmem>>, vector<1x64x128xf32>
    %78 = vector.shape_cast %77 : vector<1x64x128xf32> to vector<64x128xf32>
    %79 = vector.shape_cast %76 : vector<64x128xf32> to vector<1x64x128xf32>
    tpu.vector_store %arg4[%c4_55, %c0_56, %c0_57], %79 {strides = array<i32>} : memref<8x64x128xf32, #tpu.memory_space<vmem>>, vector<1x64x128xf32>,
    %cst_58 = arith.constant dense<0.000000e+00> : vector<128xf32>
    %80 = vector.multi_reduction <add>, %76, %cst_58 [0] : vector<64x128xf32> to vector<128xf32>
    %81 = vector.shape_cast %80 : vector<128xf32> to vector<1x128xf32>
    %cst_59 = arith.constant 6.400000e+01 : f32
    %82 = vector.broadcast %cst_59 : f32 to vector<1x128xf32>
    %83 = arith.divf %81, %82 : vector<1x128xf32>
    %c4_60 = arith.constant 4 : index
    %c0_61 = arith.constant 0 : index
    %c0_62 = arith.constant 0 : index
    %84 = vector.load %arg5[%c4_60, %c0_61, %c0_62] : memref<8x1x128xf32, #tpu.memory_space<vmem>>, vector<1x1x128xf32>
    %85 = vector.shape_cast %84 : vector<1x1x128xf32> to vector<1x128xf32>
    %86 = vector.shape_cast %83 : vector<1x128xf32> to vector<1x1x128xf32>
    tpu.vector_store %arg5[%c4_60, %c0_61, %c0_62], %86 {strides = array<i32>} : memref<8x1x128xf32, #tpu.memory_space<vmem>>, vector<1x1x128xf32>,
    %c5 = arith.constant 5 : index
    %c0_63 = arith.constant 0 : index
    %c0_64 = arith.constant 0 : index
    %87 = vector.load %arg1[%c5, %c0_63, %c0_64] : memref<8x64x27xf32, #tpu.memory_space<vmem>>, vector<1x64x27xf32>
    %88 = vector.shape_cast %87 : vector<1x64x27xf32> to vector<64x27xf32>
    %cst_65 = arith.constant dense<0.000000e+00> : vector<64x128xf32>
    %89 = tpu.matmul %88, %0, %cst_65 {dimension_numbers = #tpu.dot_dimension_numbers<[1], [0], [0], [1], [0, 0, 1, 1], [], []>} : vector<64x27xf32>, vector<27x128xf32>, vector<64x128xf32> -> vector<64x128xf32>
    %90 = vector.broadcast %1 : vector<1x128xf32> to vector<64x128xf32>
    %91 = arith.addf %89, %90 : vector<64x128xf32>
    %cst_66 = arith.constant 0.000000e+00 : f32
    %92 = vector.broadcast %cst_66 : f32 to vector<64x128xf32>
    %93 = arith.maximumf %91, %92 : vector<64x128xf32>
    %c5_67 = arith.constant 5 : index
    %c0_68 = arith.constant 0 : index
    %c0_69 = arith.constant 0 : index
    %94 = vector.load %arg4[%c5_67, %c0_68, %c0_69] : memref<8x64x128xf32, #tpu.memory_space<vmem>>, vector<1x64x128xf32>
    %95 = vector.shape_cast %94 : vector<1x64x128xf32> to vector<64x128xf32>
    %96 = vector.shape_cast %93 : vector<64x128xf32> to vector<1x64x128xf32>
    tpu.vector_store %arg4[%c5_67, %c0_68, %c0_69], %96 {strides = array<i32>} : memref<8x64x128xf32, #tpu.memory_space<vmem>>, vector<1x64x128xf32>,
    %cst_70 = arith.constant dense<0.000000e+00> : vector<128xf32>
    %97 = vector.multi_reduction <add>, %93, %cst_70 [0] : vector<64x128xf32> to vector<128xf32>
    %98 = vector.shape_cast %97 : vector<128xf32> to vector<1x128xf32>
    %cst_71 = arith.constant 6.400000e+01 : f32
    %99 = vector.broadcast %cst_71 : f32 to vector<1x128xf32>
    %100 = arith.divf %98, %99 : vector<1x128xf32>
    %c5_72 = arith.constant 5 : index
    %c0_73 = arith.constant 0 : index
    %c0_74 = arith.constant 0 : index
    %101 = vector.load %arg5[%c5_72, %c0_73, %c0_74] : memref<8x1x128xf32, #tpu.memory_space<vmem>>, vector<1x1x128xf32>
    %102 = vector.shape_cast %101 : vector<1x1x128xf32> to vector<1x128xf32>
    %103 = vector.shape_cast %100 : vector<1x128xf32> to vector<1x1x128xf32>
    tpu.vector_store %arg5[%c5_72, %c0_73, %c0_74], %103 {strides = array<i32>} : memref<8x1x128xf32, #tpu.memory_space<vmem>>, vector<1x1x128xf32>,
    %c6 = arith.constant 6 : index
    %c0_75 = arith.constant 0 : index
    %c0_76 = arith.constant 0 : index
    %104 = vector.load %arg1[%c6, %c0_75, %c0_76] : memref<8x64x27xf32, #tpu.memory_space<vmem>>, vector<1x64x27xf32>
    %105 = vector.shape_cast %104 : vector<1x64x27xf32> to vector<64x27xf32>
    %cst_77 = arith.constant dense<0.000000e+00> : vector<64x128xf32>
    %106 = tpu.matmul %105, %0, %cst_77 {dimension_numbers = #tpu.dot_dimension_numbers<[1], [0], [0], [1], [0, 0, 1, 1], [], []>} : vector<64x27xf32>, vector<27x128xf32>, vector<64x128xf32> -> vector<64x128xf32>
    %107 = vector.broadcast %1 : vector<1x128xf32> to vector<64x128xf32>
    %108 = arith.addf %106, %107 : vector<64x128xf32>
    %cst_78 = arith.constant 0.000000e+00 : f32
    %109 = vector.broadcast %cst_78 : f32 to vector<64x128xf32>
    %110 = arith.maximumf %108, %109 : vector<64x128xf32>
    %c6_79 = arith.constant 6 : index
    %c0_80 = arith.constant 0 : index
    %c0_81 = arith.constant 0 : index
    %111 = vector.load %arg4[%c6_79, %c0_80, %c0_81] : memref<8x64x128xf32, #tpu.memory_space<vmem>>, vector<1x64x128xf32>
    %112 = vector.shape_cast %111 : vector<1x64x128xf32> to vector<64x128xf32>
    %113 = vector.shape_cast %110 : vector<64x128xf32> to vector<1x64x128xf32>
    tpu.vector_store %arg4[%c6_79, %c0_80, %c0_81], %113 {strides = array<i32>} : memref<8x64x128xf32, #tpu.memory_space<vmem>>, vector<1x64x128xf32>,
    %cst_82 = arith.constant dense<0.000000e+00> : vector<128xf32>
    %114 = vector.multi_reduction <add>, %110, %cst_82 [0] : vector<64x128xf32> to vector<128xf32>
    %115 = vector.shape_cast %114 : vector<128xf32> to vector<1x128xf32>
    %cst_83 = arith.constant 6.400000e+01 : f32
    %116 = vector.broadcast %cst_83 : f32 to vector<1x128xf32>
    %117 = arith.divf %115, %116 : vector<1x128xf32>
    %c6_84 = arith.constant 6 : index
    %c0_85 = arith.constant 0 : index
    %c0_86 = arith.constant 0 : index
    %118 = vector.load %arg5[%c6_84, %c0_85, %c0_86] : memref<8x1x128xf32, #tpu.memory_space<vmem>>, vector<1x1x128xf32>
    %119 = vector.shape_cast %118 : vector<1x1x128xf32> to vector<1x128xf32>
    %120 = vector.shape_cast %117 : vector<1x128xf32> to vector<1x1x128xf32>
    tpu.vector_store %arg5[%c6_84, %c0_85, %c0_86], %120 {strides = array<i32>} : memref<8x1x128xf32, #tpu.memory_space<vmem>>, vector<1x1x128xf32>,
    %c7 = arith.constant 7 : index
    %c0_87 = arith.constant 0 : index
    %c0_88 = arith.constant 0 : index
    %121 = vector.load %arg1[%c7, %c0_87, %c0_88] : memref<8x64x27xf32, #tpu.memory_space<vmem>>, vector<1x64x27xf32>
    %122 = vector.shape_cast %121 : vector<1x64x27xf32> to vector<64x27xf32>
    %cst_89 = arith.constant dense<0.000000e+00> : vector<64x128xf32>
    %123 = tpu.matmul %122, %0, %cst_89 {dimension_numbers = #tpu.dot_dimension_numbers<[1], [0], [0], [1], [0, 0, 1, 1], [], []>} : vector<64x27xf32>, vector<27x128xf32>, vector<64x128xf32> -> vector<64x128xf32>
    %124 = vector.broadcast %1 : vector<1x128xf32> to vector<64x128xf32>
    %125 = arith.addf %123, %124 : vector<64x128xf32>
    %cst_90 = arith.constant 0.000000e+00 : f32
    %126 = vector.broadcast %cst_90 : f32 to vector<64x128xf32>
    %127 = arith.maximumf %125, %126 : vector<64x128xf32>
    %c7_91 = arith.constant 7 : index
    %c0_92 = arith.constant 0 : index
    %c0_93 = arith.constant 0 : index
    %128 = vector.load %arg4[%c7_91, %c0_92, %c0_93] : memref<8x64x128xf32, #tpu.memory_space<vmem>>, vector<1x64x128xf32>
    %129 = vector.shape_cast %128 : vector<1x64x128xf32> to vector<64x128xf32>
    %130 = vector.shape_cast %127 : vector<64x128xf32> to vector<1x64x128xf32>
    tpu.vector_store %arg4[%c7_91, %c0_92, %c0_93], %130 {strides = array<i32>} : memref<8x64x128xf32, #tpu.memory_space<vmem>>, vector<1x64x128xf32>,
    %cst_94 = arith.constant dense<0.000000e+00> : vector<128xf32>
    %131 = vector.multi_reduction <add>, %127, %cst_94 [0] : vector<64x128xf32> to vector<128xf32>
    %132 = vector.shape_cast %131 : vector<128xf32> to vector<1x128xf32>
    %cst_95 = arith.constant 6.400000e+01 : f32
    %133 = vector.broadcast %cst_95 : f32 to vector<1x128xf32>
    %134 = arith.divf %132, %133 : vector<1x128xf32>
    %c7_96 = arith.constant 7 : index
    %c0_97 = arith.constant 0 : index
    %c0_98 = arith.constant 0 : index
    %135 = vector.load %arg5[%c7_96, %c0_97, %c0_98] : memref<8x1x128xf32, #tpu.memory_space<vmem>>, vector<1x1x128xf32>
    %136 = vector.shape_cast %135 : vector<1x1x128xf32> to vector<1x128xf32>
    %137 = vector.shape_cast %134 : vector<1x128xf32> to vector<1x1x128xf32>
    tpu.vector_store %arg5[%c7_96, %c0_97, %c0_98], %137 {strides = array<i32>} : memref<8x1x128xf32, #tpu.memory_space<vmem>>, vector<1x1x128xf32>,
    return
  }
  func.func @transform_0(%arg0: i32) -> (i32, i32, i32) {
    %c0_i32 = arith.constant 0 : i32
    %c0_i32_0 = arith.constant 0 : i32
    %c0_i32_1 = arith.constant 0 : i32
    return %arg0, %c0_i32, %c0_i32_0 : i32, i32, i32
  }
  func.func @transform_1(%arg0: i32) -> (i32, i32) {
    %c0_i32 = arith.constant 0 : i32
    %c0_i32_0 = arith.constant 0 : i32
    %c0_i32_1 = arith.constant 0 : i32
    return %c0_i32, %c0_i32_0 : i32, i32
  }
  func.func @transform_2(%arg0: i32) -> (i32, i32) {
    %c0_i32 = arith.constant 0 : i32
    %c0_i32_0 = arith.constant 0 : i32
    %c0_i32_1 = arith.constant 0 : i32
    return %c0_i32, %c0_i32_0 : i32, i32
  }
  func.func @transform_3(%arg0: i32) -> (i32, i32, i32) {
    %c0_i32 = arith.constant 0 : i32
    %c0_i32_0 = arith.constant 0 : i32
    %c0_i32_1 = arith.constant 0 : i32
    return %arg0, %c0_i32, %c0_i32_0 : i32, i32, i32
  }
  func.func @transform_4(%arg0: i32) -> (i32, i32, i32) {
    %c0_i32 = arith.constant 0 : i32
    %c0_i32_0 = arith.constant 0 : i32
    %c0_i32_1 = arith.constant 0 : i32
    return %arg0, %c0_i32, %c0_i32_0 : i32, i32, i32
  }
}

module attributes {stable_mosaic.version = 11 : i64} {
  func.func @_episode_head_kernel(%arg0: i32, %arg1: memref<1x2x4xf32, #tpu.memory_space<vmem>>, %arg2: memref<1x4x128xf32, #tpu.memory_space<vmem>>, %arg3: memref<1x3x128xf32, #tpu.memory_space<vmem>>, %arg4: memref<1x128x192xf32, #tpu.memory_space<vmem>>, %arg5: memref<128x64xf32, #tpu.memory_space<vmem>>, %arg6: memref<1x64xf32, #tpu.memory_space<vmem>>, %arg7: memref<1x3x64xf32, #tpu.memory_space<vmem>>, %arg8: memref<1x2x192xf32, #tpu.memory_space<vmem>>) attributes {dimension_semantics = [#tpu.dimension_semantics<parallel>], iteration_bounds = array<i64: 2>, scalar_prefetch = 0 : i64, scratch_operands = 0 : i64, tpu.core_type = #tpu.core_type<tc>, window_params = [{transform_indices = @transform_0, window_bounds = array<i64: 1, 2, 4>}, {transform_indices = @transform_1, window_bounds = array<i64: 1, 4, 128>}, {transform_indices = @transform_2, window_bounds = array<i64: 1, 3, 128>}, {transform_indices = @transform_3, window_bounds = array<i64: 1, 128, 192>}, {pipeline_mode = #tpu.pipeline_mode<synchronous>, transform_indices = @transform_4, window_bounds = array<i64: 128, 64>}, {pipeline_mode = #tpu.pipeline_mode<synchronous>, transform_indices = @transform_5, window_bounds = array<i64: 1, 64>}, {transform_indices = @transform_6, window_bounds = array<i64: 1, 3, 64>}, {transform_indices = @transform_7, window_bounds = array<i64: 1, 2, 192>}]} {
    %c0 = arith.constant 0 : index
    %c0_0 = arith.constant 0 : index
    %c0_1 = arith.constant 0 : index
    %0 = vector.load %arg1[%c0, %c0_0, %c0_1] : memref<1x2x4xf32, #tpu.memory_space<vmem>>, vector<1x2x4xf32>
    %1 = vector.shape_cast %0 : vector<1x2x4xf32> to vector<2x4xf32>
    %c0_2 = arith.constant 0 : index
    %c0_3 = arith.constant 0 : index
    %c0_4 = arith.constant 0 : index
    %2 = vector.load %arg2[%c0_2, %c0_3, %c0_4] : memref<1x4x128xf32, #tpu.memory_space<vmem>>, vector<1x4x128xf32>
    %3 = vector.shape_cast %2 : vector<1x4x128xf32> to vector<4x128xf32>
    %cst = arith.constant dense<0.000000e+00> : vector<2xf32>
    %4 = vector.multi_reduction <add>, %1, %cst [1] : vector<2x4xf32> to vector<2xf32>
    %5 = vector.shape_cast %4 : vector<2xf32> to vector<2x1xf32>
    %cst_5 = arith.constant dense<0.000000e+00> : vector<2x128xf32>
    %6 = tpu.matmul %1, %3, %cst_5 {dimension_numbers = #tpu.dot_dimension_numbers<[1], [0], [0], [1], [0, 0, 1, 1], [], []>} : vector<2x4xf32>, vector<4x128xf32>, vector<2x128xf32> -> vector<2x128xf32>
    %7 = vector.broadcast %5 : vector<2x1xf32> to vector<2x128xf32>
    %8 = arith.divf %6, %7 : vector<2x128xf32>
    %c0_6 = arith.constant 0 : index
    %c0_7 = arith.constant 0 : index
    %c0_8 = arith.constant 0 : index
    %9 = vector.load %arg3[%c0_6, %c0_7, %c0_8] : memref<1x3x128xf32, #tpu.memory_space<vmem>>, vector<1x3x128xf32>
    %10 = vector.shape_cast %9 : vector<1x3x128xf32> to vector<3x128xf32>
    %11 = arith.mulf %10, %10 : vector<3x128xf32>
    %cst_9 = arith.constant dense<0.000000e+00> : vector<3xf32>
    %12 = vector.multi_reduction <add>, %11, %cst_9 [1] : vector<3x128xf32> to vector<3xf32>
    %13 = vector.shape_cast %12 : vector<3xf32> to vector<3x1xf32>
    %cst_10 = arith.constant 1.000000e-24 : f32
    %14 = vector.broadcast %cst_10 : f32 to vector<3x1xf32>
    %15 = arith.maximumf %13, %14 : vector<3x1xf32>
    %16 = math.rsqrt %15 : vector<3x1xf32>
    %c0_11 = arith.constant 0 : index
    %c0_12 = arith.constant 0 : index
    %17 = vector.load %arg5[%c0_11, %c0_12] : memref<128x64xf32, #tpu.memory_space<vmem>>, vector<128x64xf32>
    %cst_13 = arith.constant dense<0.000000e+00> : vector<3x64xf32>
    %18 = tpu.matmul %10, %17, %cst_13 {dimension_numbers = #tpu.dot_dimension_numbers<[1], [0], [0], [1], [0, 0, 1, 1], [], []>} : vector<3x128xf32>, vector<128x64xf32>, vector<3x64xf32> -> vector<3x64xf32>
    %19 = vector.broadcast %16 : vector<3x1xf32> to vector<3x64xf32>
    %20 = arith.mulf %18, %19 : vector<3x64xf32>
    %c0_14 = arith.constant 0 : index
    %c0_15 = arith.constant 0 : index
    %21 = vector.load %arg6[%c0_14, %c0_15] : memref<1x64xf32, #tpu.memory_space<vmem>>, vector<1x64xf32>
    %22 = vector.broadcast %21 : vector<1x64xf32> to vector<3x64xf32>
    %23 = arith.addf %20, %22 : vector<3x64xf32>
    %c0_16 = arith.constant 0 : index
    %c0_17 = arith.constant 0 : index
    %c0_18 = arith.constant 0 : index
    %24 = vector.load %arg7[%c0_16, %c0_17, %c0_18] : memref<1x3x64xf32, #tpu.memory_space<vmem>>, vector<1x3x64xf32>
    %25 = vector.shape_cast %24 : vector<1x3x64xf32> to vector<3x64xf32>
    %26 = vector.shape_cast %23 : vector<3x64xf32> to vector<1x3x64xf32>
    tpu.vector_store %arg7[%c0_16, %c0_17, %c0_18], %26 {strides = array<i32>} : memref<1x3x64xf32, #tpu.memory_space<vmem>>, vector<1x3x64xf32>,
    %27 = arith.mulf %8, %8 : vector<2x128xf32>
    %cst_19 = arith.constant dense<0.000000e+00> : vector<2xf32>
    %28 = vector.multi_reduction <add>, %27, %cst_19 [1] : vector<2x128xf32> to vector<2xf32>
    %29 = vector.shape_cast %28 : vector<2xf32> to vector<2x1xf32>
    %cst_20 = arith.constant 1.000000e-24 : f32
    %30 = vector.broadcast %cst_20 : f32 to vector<2x1xf32>
    %31 = arith.maximumf %29, %30 : vector<2x1xf32>
    %32 = math.rsqrt %31 : vector<2x1xf32>
    %33 = vector.broadcast %32 : vector<2x1xf32> to vector<2x128xf32>
    %34 = arith.mulf %8, %33 : vector<2x128xf32>
    %c0_21 = arith.constant 0 : index
    %c0_22 = arith.constant 0 : index
    %c0_23 = arith.constant 0 : index
    %35 = vector.load %arg4[%c0_21, %c0_22, %c0_23] : memref<1x128x192xf32, #tpu.memory_space<vmem>>, vector<1x128x192xf32>
    %36 = vector.shape_cast %35 : vector<1x128x192xf32> to vector<128x192xf32>
    %cst_24 = arith.constant dense<0.000000e+00> : vector<2x192xf32>
    %37 = tpu.matmul %34, %36, %cst_24 {dimension_numbers = #tpu.dot_dimension_numbers<[1], [0], [0], [1], [0, 0, 1, 1], [], []>} : vector<2x128xf32>, vector<128x192xf32>, vector<2x192xf32> -> vector<2x192xf32>
    %38 = arith.mulf %36, %36 : vector<128x192xf32>
    %cst_25 = arith.constant dense<0.000000e+00> : vector<192xf32>
    %39 = vector.multi_reduction <add>, %38, %cst_25 [0] : vector<128x192xf32> to vector<192xf32>
    %40 = vector.shape_cast %39 : vector<192xf32> to vector<1x192xf32>
    %cst_26 = arith.constant 1.000000e+00 : f32
    %41 = vector.broadcast %cst_26 : f32 to vector<2x192xf32>
    %42 = arith.mulf %41, %37 : vector<2x192xf32>
    %cst_27 = arith.constant 1.000000e-24 : f32
    %43 = vector.broadcast %cst_27 : f32 to vector<1x192xf32>
    %44 = arith.maximumf %40, %43 : vector<1x192xf32>
    %45 = math.rsqrt %44 : vector<1x192xf32>
    %46 = vector.broadcast %45 : vector<1x192xf32> to vector<2x192xf32>
    %47 = arith.mulf %42, %46 : vector<2x192xf32>
    %c0_28 = arith.constant 0 : index
    %c0_29 = arith.constant 0 : index
    %c0_30 = arith.constant 0 : index
    %48 = vector.load %arg8[%c0_28, %c0_29, %c0_30] : memref<1x2x192xf32, #tpu.memory_space<vmem>>, vector<1x2x192xf32>
    %49 = vector.shape_cast %48 : vector<1x2x192xf32> to vector<2x192xf32>
    %50 = vector.shape_cast %47 : vector<2x192xf32> to vector<1x2x192xf32>
    tpu.vector_store %arg8[%c0_28, %c0_29, %c0_30], %50 {strides = array<i32>} : memref<1x2x192xf32, #tpu.memory_space<vmem>>, vector<1x2x192xf32>,
    return
  }
  func.func @transform_0(%arg0: i32) -> (i32, i32, i32) {
    %c0_i32 = arith.constant 0 : i32
    %c0_i32_0 = arith.constant 0 : i32
    %c0_i32_1 = arith.constant 0 : i32
    return %arg0, %c0_i32, %c0_i32_0 : i32, i32, i32
  }
  func.func @transform_1(%arg0: i32) -> (i32, i32, i32) {
    %c0_i32 = arith.constant 0 : i32
    %c0_i32_0 = arith.constant 0 : i32
    %c0_i32_1 = arith.constant 0 : i32
    return %arg0, %c0_i32, %c0_i32_0 : i32, i32, i32
  }
  func.func @transform_2(%arg0: i32) -> (i32, i32, i32) {
    %c0_i32 = arith.constant 0 : i32
    %c0_i32_0 = arith.constant 0 : i32
    %c0_i32_1 = arith.constant 0 : i32
    return %arg0, %c0_i32, %c0_i32_0 : i32, i32, i32
  }
  func.func @transform_3(%arg0: i32) -> (i32, i32, i32) {
    %c0_i32 = arith.constant 0 : i32
    %c0_i32_0 = arith.constant 0 : i32
    %c0_i32_1 = arith.constant 0 : i32
    return %arg0, %c0_i32, %c0_i32_0 : i32, i32, i32
  }
  func.func @transform_4(%arg0: i32) -> (i32, i32) {
    %c0_i32 = arith.constant 0 : i32
    %c0_i32_0 = arith.constant 0 : i32
    %c0_i32_1 = arith.constant 0 : i32
    return %c0_i32, %c0_i32_0 : i32, i32
  }
  func.func @transform_5(%arg0: i32) -> (i32, i32) {
    %c0_i32 = arith.constant 0 : i32
    %c0_i32_0 = arith.constant 0 : i32
    %c0_i32_1 = arith.constant 0 : i32
    return %c0_i32, %c0_i32_0 : i32, i32
  }
  func.func @transform_6(%arg0: i32) -> (i32, i32, i32) {
    %c0_i32 = arith.constant 0 : i32
    %c0_i32_0 = arith.constant 0 : i32
    %c0_i32_1 = arith.constant 0 : i32
    return %arg0, %c0_i32, %c0_i32_0 : i32, i32, i32
  }
  func.func @transform_7(%arg0: i32) -> (i32, i32, i32) {
    %c0_i32 = arith.constant 0 : i32
    %c0_i32_0 = arith.constant 0 : i32
    %c0_i32_1 = arith.constant 0 : i32
    return %arg0, %c0_i32, %c0_i32_0 : i32, i32, i32
  }
}

</mosaic_0001>

<bundles_post_ra>
// kernel: model_forward.3
= control target key start
LH: loop header
LB: loop body
LE: loop exit
PB: predicated region body
PF: predicated region fallthrough
CT: control target
= control target key end

     0   :  { %s1027_s24 = smov 0   ;;  %s1290_s0 = inlined_call_operand.vmem [shape: f32[2,2,4], index: 0, kind: input, shape index: {}]   ;;  %s1291_s1 = inlined_call_operand.vmem [shape: f32[2,4,128], index: 1, kind: input, shape index: {}]   ;;  %s1292_s2 = inlined_call_operand.vmem [shape: f32[2,3,128], index: 2, kind: input, shape index: {}]   ;;  %s1293_s3 = inlined_call_operand.vmem [shape: f32[2,128,192], index: 3, kind: input, shape index: {}]   ;;  %s1294_s4 = inlined_call_operand.vmem [shape: f32[128,64], index: 4, kind: input, shape index: {}]   ;;  %s1295_s5 = inlined_call_operand.vmem [shape: f32[1,64], index: 5, kind: input, shape index: {}]   ;;  %s1296_s6 = inlined_call_operand.vmem [shape: f32[2,3,64], index: 6, kind: output, shape index: {0}]   ;;  %s1297_s7 = inlined_call_operand.vmem [shape: f32[2,2,192], index: 7, kind: output, shape index: {1}]  }
   0x1 LB: > { %s876_s25 = sadd.s32 4294967295, %s982_s24   ;;  %p880_p0 = scmp.ge.s32.totalorder %s982_s24, 1  ;;  %s982_s24 = sphi %s1027_s24, %s18_s24  }
   0x2   : > { %p267_p1 = scmp.lt.s32.totalorder %s982_s24, 3 }
   0x4   : > { %p268_p2 = pnand %p880_p0, %p267_p1 }
   0x5   : > { %p315_p3 = scmp.lt.s32.totalorder (!%p268_p2), %s876_s25, 1 }
   0x6   : > { %271 = sbr.rel (%p268_p2) target bundleno = 572 (0x23c), region = 44 }
   0xb   : > { %v984_v0 = vmov 0.0   ;;  %vm985_vm0 = vmmov 0   ;;  %s1299_s25 = smov (!%p315_p3, %s876_s25), 1  ;;  %vm351_vm1 = vcmask 1043456   ;;  %vm347_vm2 = vcmask 31744   ;;  %v450_v7 = vld [vmem:[%s1294_s4 + $0x78] sm:$0xff] }
   0xc   : > { %915 = vmatprep.subr.mxu0 %v984_v0  ;;  %917 = vmatprep.mubr.msk.f32.mxu0 %vm985_vm0, %v984_v0  ;;  %s1039_s26 = sshll.u32 %s1299_s25, 2  ;;  %s881_s30 = sshll.u32 %s1299_s25, 1  ;;  %vm343_vm3 = vcmask 25600   ;;  %v449_v10 = vld [vmem:[%s1294_s4 + $0x70] sm:$0xff]  ;;  %v448_v12 = vld [vmem:[%s1294_s4 + $0x68] sm:$0xff]  ;;  %v447_v15 = vld [vmem:[%s1294_s4 + $0x60] sm:$0xff] }
   0xd   : > { %920 = vmatprep.subr.mxu1 %v984_v0  ;;  %952 = vmatprep.mubr.msk.f32.mxu1 %vm985_vm0, %v984_v0  ;;  %s322_s29 = scalar_lea.vmem %s1291_s1, %s1039_s26  ;;  %s318_s10 = scalar_lea.vmem %s1290_s0, %s881_s30  ;;  %v446_v18 = vld [vmem:[%s1294_s4 + $0x58] sm:$0xff]  ;;  %v445_v21 = vld [vmem:[%s1294_s4 + $0x50] sm:$0xff]  ;;  %vm533_vm4 = vcmask 1041408   ;;  %v444_v32 = vld [vmem:[%s1294_s4 + $0x48] sm:$0xff]  ;;  %vm696_vm5 = vcmask 523264   ;;  %vm429_vm6 = vcmask 1042432  }
   0xe   : > { %v342_v1 = vld [vmem:[%s322_s29] sm:$0xf]  ;;  %s894_s11 = sshll.u32 %s1299_s25, 8  ;;  %921 = vmatpush3.msra.mxu1 %v450_v7  ;;  %v442_v38 = vld [vmem:[%s1294_s4 + $0x38] sm:$0xff]  ;;  %v441_v41 = vld [vmem:[%s1294_s4 + $0x30] sm:$0xff]  ;;  %s326_s30 = scalar_lea.vmem %s1292_s2, %s1039_s26  ;;  %vm530_vm7 = vcmask 518144  }
   0xf   : > { %916 = vmatpush3.msk.msra.mxu0 %vm351_vm1, %v342_v1  ;;  %v341_v2 = vld [vmem:[%s318_s10] sm:$0x3]  ;;  %s1052_s14 = scalar_lea.vmem %s1293_s3, %s894_s11  ;;  %922 = vmatprep.subr.mxu1 %v984_v0  ;;  %v440_v44 = vld [vmem:[%s1294_s4 + $0x28] sm:$0xff]  ;;  %v438_v60 = vld [vmem:[%s1294_s4 + $0x18] sm:$0xff]  ;;  %s335_s12 = scalar_lea.vmem %s1296_s6, %s1039_s26  ;;  %vm751_vm8 = vcmask 519170  }
  0x10   : > { %918 = vmatmul.mubr.msk.f32.vlgmr.msra.gmra.mxu0 %vm347_vm2, %v341_v2  ;;  %v344_v3 = vsel %vm343_vm3, %v341_v2, 0.0  ;;  %v1055_v4 = vld [vmem:[%s1052_s14 + $0xf8] sm:$0xff]  ;;  %v1058_v5 = vld [vmem:[%s1052_s14 + $0xf0] sm:$0xff]  ;;  %v1062_v6 = vld [vmem:[%s1052_s14 + $0xe8] sm:$0xff]  ;;  %923 = vmatpush3.msra.mxu1 %v449_v10  ;;  %s340_s16 = scalar_lea.vmem %s1297_s7, %s1039_s26 }
  0x11   : > { %345 = vadd.xlane.f32.xlu0 %v344_v3  ;;  %636 = vmatprep.mubr.f32.mxu0 %v984_v0  ;;  %v1068_v8 = vld [vmem:[%s1052_s14 + $0xe0] sm:$0xff]  ;;  %v1072_v9 = vld [vmem:[%s1052_s14 + $0xd8] sm:$0xff]  ;;  %v1080_v11 = vld [vmem:[%s1052_s14 + $0xd0] sm:$0xff] }
  0x12   : > { %572 = vmatprep.subr.mxu0 %v1055_v4  ;;  %v1087_v13 = vld [vmem:[%s1052_s14 + $0xc8] sm:$0xff]  ;;  %924 = vmatprep.subr.mxu1 %v984_v0  ;;  %v1092_v14 = vld [vmem:[%s1052_s14 + $0xc0] sm:$0xff]  ;;  %v1099_v16 = vld [vmem:[%s1052_s14 + $0xb8] sm:$0xff] }
  0x13   : > { %573 = vmatpush1.msra.mxu0 %v1058_v5  ;;  %925 = vmatpush3.msra.mxu1 %v448_v12  ;;  %v1104_v17 = vld [vmem:[%s1052_s14 + $0xb0] sm:$0xff]  ;;  %v1111_v19 = vld [vmem:[%s1052_s14 + $0xa8] sm:$0xff]  ;;  %v1116_v20 = vld [vmem:[%s1052_s14 + $0xa0] sm:$0xff] }
  0x14   : > { %574 = vmatprep.subr.mxu0 %v1062_v6  ;;  %926 = vmatprep.subr.mxu1 %v984_v0  ;;  %v1123_v22 = vld [vmem:[%s1052_s14 + $0x98] sm:$0xff]  ;;  %v1128_v23 = vld [vmem:[%s1052_s14 + $0x90] sm:$0xff]  ;;  %v1140_v31 = vld [vmem:[%s1052_s14 + $0x88] sm:$0xff] }
  0x15   : > { %575 = vmatpush1.msra.mxu0 %v1068_v8  ;;  %927 = vmatpush3.msra.mxu1 %v447_v15  ;;  %v1147_v33 = vld [vmem:[%s1052_s14 + $0x80] sm:$0xff]  ;;  %v1151_v34 = vld [vmem:[%s1052_s14 + $0x78] sm:$0xff]  ;;  %v1159_v36 = vld [vmem:[%s1052_s14 + $0x70] sm:$0xff] }
  0x16   : > { %576 = vmatprep.subr.mxu0 %v1072_v9  ;;  %928 = vmatprep.subr.mxu1 %v984_v0  ;;  %v443_v35 = vld [vmem:[%s1294_s4 + $0x40] sm:$0xff]  ;;  %v1162_v37 = vld [vmem:[%s1052_s14 + $0x68] sm:$0xff]  ;;  %v551_v40 = vld [vmem:[%s1052_s14 + $0x58] sm:$0xff] }
  0x17   : > { %577 = vmatpush1.msra.mxu0 %v1080_v11  ;;  %929 = vmatpush3.msra.mxu1 %v446_v18  ;;  %v1169_v39 = vld [vmem:[%s1052_s14 + $0x60] sm:$0xff]  ;;  %v550_v42 = vld [vmem:[%s1052_s14 + $0x50] sm:$0xff]  ;;  %v549_v43 = vld [vmem:[%s1052_s14 + $0x48] sm:$0xff]  ;;  %v654_v18 = vmul.f32 %v551_v40, %v551_v40 }
  0x18   : > { %578 = vmatprep.subr.mxu0 %v1087_v13  ;;  %930 = vmatprep.subr.mxu1 %v984_v0  ;;  %v548_v45 = vld [vmem:[%s1052_s14 + $0x40] sm:$0xff]  ;;  %v545_v46 = vld [vmem:[%s1052_s14 + $0x28] sm:$0xff]  ;;  %v547_v47 = vld [vmem:[%s1052_s14 + $0x38] sm:$0xff]  ;;  %v652_v1 = vmul.f32 %v549_v43, %v549_v43 }
  0x19   : > { %579 = vmatpush1.msra.mxu0 %v1092_v14  ;;  %931 = vmatpush3.msra.mxu1 %v445_v21  ;;  %v439_v48 = vld [vmem:[%s1294_s4 + $0x20] sm:$0xff]  ;;  %v648_v49 = vmul.f32 %v545_v46, %v545_v46  ;;  %v543_v50 = vld [vmem:[%s1052_s14 + $0x18] sm:$0xff]  ;;  %v546_v51 = vld [vmem:[%s1052_s14 + $0x30] sm:$0xff]  ;;  %v650_v55 = vmul.f32 %v547_v47, %v547_v47 }
  0x1a   : > { %580 = vmatprep.subr.mxu0 %v1099_v16  ;;  %932 = vmatprep.subr.mxu1 %v984_v0  ;;  %v646_v52 = vmul.f32 %v543_v50, %v543_v50  ;;  %v542_v53 = vld [vmem:[%s1052_s14 + $0x10] sm:$0xff]  ;;  %v541_v54 = vld [vmem:[%s1052_s14 + $0x8] sm:$0xff]  ;;  %v544_v56 = vld [vmem:[%s1052_s14 + $0x20] sm:$0xff]  ;;  %v649_v7 = vmul.f32 %v546_v51, %v546_v51 }
  0x1b   : > { %581 = vmatpush1.msra.mxu0 %v1104_v17  ;;  %933 = vmatpush3.msra.mxu1 %v444_v32  ;;  %v645_v57 = vmul.f32 %v542_v53, %v542_v53  ;;  %v644_v58 = vmul.f32 %v541_v54, %v541_v54  ;;  %v540_v59 = vld [vmem:[%s1052_s14] sm:$0xff]  ;;  %v647_v61 = vmul.f32 %v544_v56, %v544_v56  ;;  %v700_v2 = vsel %vm696_vm5, %v648_v49, 0.0  ;;  %v437_v10 = vld [vmem:[%s1294_s4 + $0x10] sm:$0xff]  ;;  %vm752_vm9 = vmor %vm751_vm8, %vm533_vm4 }
  0x1c   : > { %582 = vmatprep.subr.mxu0 %v1111_v19  ;;  %934 = vmatprep.subr.mxu1 %v984_v0  ;;  %v698_v62 = vsel %vm696_vm5, %v646_v52, 0.0  ;;  %v643_v63 = vmul.f32 %v540_v59, %v540_v59  ;;  %v702_v21 = vsel %vm696_vm5, %v650_v55, 0.0  ;;  %v653_v32 = vmul.f32 %v550_v42, %v550_v42 }
  0x1d   : > { %583 = vmatpush1.msra.mxu0 %v1116_v20  ;;  %935 = vmatpush3.msra.mxu1 %v443_v35  ;;  %v697_v3 = vsel %vm696_vm5, %v644_v58, 0.0  ;;  %v662_v49 = vmul.f32 %v1123_v22, %v1123_v22  ;;  %v661_v55 = vmul.f32 %v1128_v23, %v1128_v23 }
  0x1e   : > { %584 = vmatprep.subr.mxu0 %v1123_v22  ;;  %936 = vmatprep.subr.mxu1 %v984_v0  ;;  %v699_v12 = vadd.f32 %v698_v62, %v697_v3  ;;  %v675_v15 = vadd.f32 %v645_v57, %v643_v63  ;;  %v666_v22 = vmul.f32 %v1099_v16, %v1099_v16 }
  0x1f   : > { %585 = vmatpush1.msra.mxu0 %v1128_v23  ;;  %937 = vmatpush3.msra.mxu1 %v442_v38  ;;  %v714_v58 = vsel %vm696_vm5, %v662_v49, 0.0 }
  0x20   : > { %586 = vmatprep.subr.mxu0 %v1140_v31  ;;  %938 = vmatprep.subr.mxu1 %v984_v0  ;;  %v718_v23 = vsel %vm696_vm5, %v666_v22, 0.0 }
  0x21   : > { %587 = vmatpush1.msra.mxu0 %v1147_v33  ;;  %939 = vmatpush3.msra.mxu1 %v441_v41  ;;  %v706_v41 = vsel %vm696_vm5, %v654_v18, 0.0  ;;  %v670_v18 = vmul.f32 %v1072_v9, %v1072_v9  ;;  %v673_v9 = vmul.f32 %v1058_v5, %v1058_v5  ;;  %v891_v5 = vld [vmem:[%s1295_s5] ss:$0 sm:$0xff] }
  0x22   : > { %588 = vmatprep.subr.mxu0 %v1151_v34  ;;  %940 = vmatprep.subr.mxu1 %v984_v0 }
  0x23   : > { %589 = vmatpush1.msra.mxu0 %v1159_v36  ;;  %941 = vmatpush3.msra.mxu1 %v440_v44 }
  0x24   : > { %590 = vmatprep.subr.mxu0 %v1162_v37  ;;  %942 = vmatprep.subr.mxu1 %v984_v0 }
  0x25   : > { %591 = vmatpush1.msra.mxu0 %v1169_v39  ;;  %943 = vmatpush3.msra.mxu1 %v439_v48 }
  0x26   : > { %592 = vmatprep.subr.mxu0 %v551_v40  ;;  %944 = vmatprep.subr.mxu1 %v984_v0  ;;  %v658_v40 = vmul.f32 %v1151_v34, %v1151_v34  ;;  %v660_v34 = vmul.f32 %v1140_v31, %v1140_v31  ;;  %v659_v31 = vmul.f32 %v1147_v33, %v1147_v33 }
  0x27   : > { %593 = vmatpush1.msra.mxu0 %v550_v42  ;;  %945 = vmatpush3.msra.mxu1 %v438_v60  ;;  %v435_v42 = vld [vmem:[%s1294_s4] sm:$0xff]  ;;  %v663_v33 = vmul.f32 %v1116_v20, %v1116_v20 }
  0x28   : > { %594 = vmatprep.subr.mxu0 %v549_v43  ;;  %946 = vmatprep.subr.mxu1 %v984_v0 }
  0x29   : > { %595 = vmatpush1.msra.mxu0 %v548_v45  ;;  %947 = vmatpush3.msra.mxu1 %v437_v10 }
  0x2a   : > { %596 = vmatprep.subr.mxu0 %v547_v47  ;;  %948 = vmatprep.subr.mxu1 %v984_v0 }
  0x2b   : > { %597 = vmatpush1.msra.mxu0 %v546_v51 }
  0x2c   : > { %598 = vmatprep.subr.mxu0 %v545_v46  ;;  %v427_v46 = vld [vmem:[%s326_s30] sm:$0x7] }
  0x2d   : > { %599 = vmatpush1.msra.mxu0 %v544_v56  ;;  %v428_v48 = vmul.f32 %v427_v46, %v427_v46 }
  0x2e   : > { %600 = vmatprep.subr.mxu0 %v543_v50  ;;  %v710_v50 = vsel %vm696_vm5, %v658_v40, 0.0 }
  0x2f   : > { %601 = vmatpush1.msra.mxu0 %v542_v53  ;;  %v430_v53 = vsel %vm429_vm6, %v428_v48, 0.0 }
  0x30   : > { %602 = vmatprep.subr.mxu0 %v541_v54  ;;  %v664_v54 = vmul.f32 %v1111_v19, %v1111_v19  ;;  %431 = vadd.xlane.f32.xlu1 %v430_v53 }
  0x31   : > { %603 = vmatpush1.msra.mxu0 %v540_v59 }
  0x32   : > { %v716_v19 = vsel %vm696_vm5, %v664_v54, 0.0 }
  0x9a   : > { %v346_v24 = vpop.xlane.xlu0 %345 }
  0x9b   : > { %966 = vrcp.f32 %v346_v24  ;;  %v651_v24 = vmul.f32 %v548_v45, %v548_v45 }
  0xa8   : > { %v967_v25 = vpop.eup %966 }
  0xb9   : > { %v432_v40 = vpop.xlane.xlu1 %431 }
  0xd0   : > { %v421_v26 = vpop.f32.mrf.mxu0 }
  0xd1   : > { %v1134_v27 = vmul.f32 %v967_v25, %v421_v26  ;;  %v701_v25 = vadd.f32 %v700_v2, %v699_v12  ;;  %v436_v26 = vld [vmem:[%s1294_s4 + $0x8] sm:$0xff] }
  0xd2   : > { %v919_v28 = vpop.f32.mrf.mxu0  ;;  %949 = vmatpush3.msra.mxu1 %v436_v26 }
  0xd3   : > { %v532_v29 = vmul.f32 %v1134_v27, %v1134_v27  ;;  %v676_v28 = vadd.f32 %v675_v15, %v647_v61  ;;  %v703_v35 = vadd.f32 %v702_v21, %v701_v25  ;;  %950 = vmatprep.subr.mxu1 %v984_v0  ;;  %v665_v61 = vmul.f32 %v1104_v17, %v1104_v17 }
  0xd4   : > { %951 = vmatpush3.msra.mxu1 %v435_v42  ;;  %v668_v15 = vmul.f32 %v1087_v13, %v1087_v13  ;;  %v667_v17 = vmul.f32 %v1092_v14, %v1092_v14  ;;  %v669_v21 = vmul.f32 %v1080_v11, %v1080_v11  ;;  %v674_v13 = vmul.f32 %v1055_v4, %v1055_v4 }
  0xd5   : > { %v534_v30 = vsel %vm533_vm4, %v532_v29, 0.0  ;;  %v656_v29 = vmul.f32 %v1162_v37, %v1162_v37  ;;  %v677_v38 = vadd.f32 %v676_v28, %v649_v7  ;;  %v655_v37 = vmul.f32 %v1169_v39, %v1169_v39  ;;  %953 = vmatmul.mubr.f32.vlgmr.msra.gmra.mxu1 %v427_v46 }
  0xd6   : > { %535 = vadd.xlane.f32.xlu0 %v534_v30  ;;  %v704_v30 = vsel %vm696_vm5, %v652_v1, 0.0  ;;  %v657_v39 = vmul.f32 %v1159_v36, %v1159_v36  ;;  %v712_v36 = vsel %vm696_vm5, %v660_v34, 0.0  ;;  %v720_v25 = vsel %vm696_vm5, %v668_v15, 0.0 }
  0xd7   : > { %v705_v43 = vadd.f32 %v704_v30, %v703_v35  ;;  %v678_v44 = vadd.f32 %v677_v38, %v651_v24  ;;  %v708_v45 = vsel %vm696_vm5, %v656_v29, 0.0  ;;  %v672_v24 = vmul.f32 %v1062_v6, %v1062_v6 }
  0xd8   : > { %v722_v14 = vsel %vm696_vm5, %v670_v18, 0.0 }
  0xd9   : > { %v707_v0 = vadd.f32 %v706_v41, %v705_v43  ;;  %v679_v47 = vadd.f32 %v678_v44, %v653_v32  ;;  %v724_v29 = vsel %vm696_vm5, %v672_v24, 0.0  ;;  %v726_v32 = vsel %vm696_vm5, %v674_v13, 0.0 }
  0xda   : > { %v433_v41 = vmax.f32 %v432_v40, 1e-24 }
  0xdb   : > { %v709_v51 = vadd.f32 %v708_v45, %v707_v0  ;;  %v680_v52 = vadd.f32 %v679_v47, %v655_v37 }
  0xdd   : > { %v711_v56 = vadd.f32 %v710_v50, %v709_v51  ;;  %v681_v57 = vadd.f32 %v680_v52, %v657_v39 }
  0xdf   : > { %v713_v59 = vadd.f32 %v712_v36, %v711_v56  ;;  %v682_v60 = vadd.f32 %v681_v57, %v659_v31  ;;  %v986_v36 = vmov 1983009808   ;;  %v746_v56 = vlaneseq }
  0xe1   : > { %v715_v62 = vadd.f32 %v714_v58, %v713_v59  ;;  %v683_v63 = vadd.f32 %v682_v60, %v661_v55  ;;  %v744_v55 = vunpack.c.l.s4 %v986_v36  ;;  %v747_v58 = vshrl.u32 %v746_v56, 7 }
  0xe3   : > { %v717_v1 = vadd.f32 %v716_v19, %v715_v62  ;;  %v684_v2 = vadd.f32 %v683_v63, %v663_v33  ;;  %v745_v22 = vunpack.c.0.s8 %v744_v55 }
  0xe5   : > { %v719_v3 = vadd.f32 %v718_v23, %v717_v1  ;;  %v685_v16 = vadd.f32 %v684_v2, %v665_v61  ;;  %v748_v62 = vsub.s32 %v745_v22, %v747_v58 }
  0xe7   : > { %v686_v26 = vadd.f32 %v685_v16, %v667_v17  ;;  %v721_v11 = vadd.f32 %v720_v25, %v719_v3 }
  0xe9   : > { %v687_v28 = vadd.f32 %v686_v26, %v669_v21  ;;  %v723_v30 = vadd.f32 %v722_v14, %v721_v11 }
 0x15f   : > { %v536_v7 = vpop.xlane.xlu0 %535 }
 0x160   : > { %v537_v10 = vmax.f32 %v536_v7, 1e-24 }
 0x162   : > { %968 = vrsqrt.f32 %v537_v10 }
 0x163   : > { %970 = vrsqrt.f32 %v433_v41 }
 0x16f   : > { %v969_v12 = vpop.eup %968 }
 0x170   : > { %v539_v20 = vmul.f32 %v969_v12, %v1134_v27  ;;  %v671_v27 = vmul.f32 %v1068_v8, %v1068_v8  ;;  %v725_v8 = vadd.f32 %v724_v29, %v723_v30  ;;  %v971_v4 = vpop.eup %970 }
 0x172   : > { %637 = vmatmul.mubr.f32.vlgmr.msra.gmra.mxu0 %v539_v20  ;;  %v688_v6 = vadd.f32 %v687_v28, %v671_v27  ;;  %v727_v38 = vadd.f32 %v726_v32, %v725_v8 }
 0x174   : > { %v689_v35 = vadd.f32 %v688_v6, %v673_v9  ;;  %v728_v45 = vrot.slane %v727_v38, 4 }
 0x176   : > { %v690_v34 = vrot.slane %v689_v35, 4  ;;  %v729_v39 = vadd.f32 %v728_v45, %v727_v38 }
 0x178   : > { %v691_v46 = vadd.f32 %v690_v34, %v689_v35  ;;  %v730_v47 = vrot.slane %v729_v39, 2 }
 0x17a   : > { %v692_v0 = vrot.slane %v691_v46, 2  ;;  %v731_v49 = vadd.f32 %v730_v47, %v729_v39 }
 0x17c   : > { %v693_v48 = vadd.f32 %v692_v0, %v691_v46  ;;  %v732_v31 = vrot.slane %v731_v49, 1 }
 0x17e   : > { %v694_v50 = vrot.slane %v693_v48, 1  ;;  %v733_v52 = vadd.f32 %v732_v31, %v731_v49 }
 0x180   : > { %v695_v51 = vadd.f32 %v694_v50, %v693_v48  ;;  %v735_v54 = vmax.f32 %v733_v52, 1e-24 }
 0x182   : > { %v734_v53 = vmax.f32 %v695_v51, 1e-24 }
 0x184   : > { %972 = vrsqrt.f32 %v734_v53 }
 0x185   : > { %974 = vrsqrt.f32 %v735_v54 }
 0x191   : > { %v973_v57 = vpop.eup %972 }
 0x192   : > { %v975_v33 = vpop.eup %974 }
 0x195   : > { %v517_v37 = vpop.f32.mrf.mxu1 }
 0x196   : > { %v521_v43 = vmul.f32 %v971_v4, %v517_v37 }
 0x197   : > { %v954_v44 = vpop.f32.mrf.mxu1 }
 0x198   : > { %v529_v42 = vadd.f32 %v891_v5, %v521_v43 }
 0x19a   : > { %531 = vst.msk [vmem:[%s335_s12] sm:$0x7] %vm530_vm7, %v529_v42 }
 0x232   : > { %v638_v59 = vpop.f32.mrf.mxu0 }
 0x233   : > { %v738_v19 = vmul.f32 %v973_v57, %v638_v59 }
 0x234   : > { %v640_v60 = vpop.f32.mrf.mxu0 }
 0x235   : > { %v739_v61 = vmul.f32 %v975_v33, %v640_v60 }
 0x237   : > { %v742_v63 = vcombine.low %v738_v19, %v739_v61 }
 0x239   : > { %v749_v23 = vrot.slane %v742_v63, %v748_v62 }
 0x23b   : > { %753 = vst.msk [vmem:[%s340_s16] sm:$0xf] %vm752_vm9, %v749_v23 }
 0x23c PF: > { %s18_s24 = sadd.s32 1, %s982_s24  }
 0x23d   : > { %p15_p4 = scmp.ge.s32.totalorder %s18_s24, 4  }
 0x23f   :  { %17 = sbr.rel (!%p15_p4) target bundleno = 1 (0x1), region = 95 }

// kernel: model_forward.2
= control target key start
LH: loop header
LB: loop body
LE: loop exit
PB: predicated region body
PF: predicated region fallthrough
CT: control target
= control target key end

     0   :  { %s2191_s15 = smov 0   ;;  %s2594_s0 = inlined_call_operand.vmem [shape: f32[16,64,27], index: 0, kind: input, shape index: {}]   ;;  %s2595_s1 = inlined_call_operand.vmem [shape: f32[27,128], index: 1, kind: input, shape index: {}]   ;;  %s2596_s2 = inlined_call_operand.vmem [shape: f32[1,128], index: 2, kind: input, shape index: {}]   ;;  %s2597_s3 = inlined_call_operand.vmem [shape: f32[16,64,128], index: 3, kind: output, shape index: {0}]   ;;  %s2598_s4 = inlined_call_operand.vmem [shape: f32[16,1,128], index: 4, kind: output, shape index: {1}]  }
   0x1 LB: > { %s1686_s16 = sadd.s32 4294967295, %s2164_s15   ;;  %p1690_p0 = scmp.ge.s32.totalorder %s2164_s15, 1  ;;  %s2164_s15 = sphi %s2191_s15, %s15_s15  }
   0x2   : > { %p167_p1 = scmp.lt.s32.totalorder %s2164_s15, 3 }
   0x4   : > { %p168_p2 = pnand %p1690_p0, %p167_p1 }
   0x5   : > { %s1691_s21 = sshll.u32 (!%p168_p2), %s1686_s16, 3 }
   0x6   : > { %171 = sbr.rel (%p168_p2) target bundleno = 300 (0x12c), region = 32  ;;  %p200_p3 = scmp.lt.s32.totalorder (!%p168_p2), %s1691_s21, 15 }
   0xb   : > { %v2202_v0 = vld [vmem:[%s2595_s1 + $0x18] sm:$0x7]  ;;  %vm262_vm0 = vcmask 1042432   ;;  %v2207_v1 = vld [vmem:[%s2595_s1 + $0x10] sm:$0xff]  ;;  %v2220_v2 = vld [vmem:[%s2595_s1 + $0x8] sm:$0xff]  ;;  %s2600_s21 = smov (!%p200_p3, %s1691_s21), 15 }
   0xc   : > { %1990 = vmatprep.subr.msk.mxu0 %vm262_vm0, %v2202_v0  ;;  %2010 = vmatprep.subr.msk.mxu1 %vm262_vm0, %v2202_v0  ;;  %v2231_v3 = vld [vmem:[%s2595_s1] sm:$0xff]  ;;  %s1892_s26 = sshll.u32 %s2600_s21, 6  ;;  %vm237_vm1 = vcmask 220160   ;;  %s2517_s11 = scalar_lea.vmem %s2598_s4, %s2600_s21 }
   0xd   : > { %1991 = vmatpush3.msk.msra.mxu0 %vm262_vm0, %v2202_v0  ;;  %2011 = vmatpush3.msk.msra.mxu1 %vm262_vm0, %v2202_v0  ;;  %s2243_s29 = scalar_lea.vmem %s2594_s0, %s1892_s26  ;;  %s2449_s8 = scalar_lea.vmem %s2597_s3, %s1892_s26 }
   0xe   : > { %1992 = vmatprep.subr.mxu0 %v2207_v1  ;;  %2012 = vmatprep.subr.mxu1 %v2207_v1  ;;  %v223_v4 = vld [vmem:[%s2243_s29] sm:$0xff]  ;;  %v224_v6 = vld [vmem:[%s2243_s29 + $0x8] sm:$0xff]  ;;  %v225_v8 = vld [vmem:[%s2243_s29 + $0x10] sm:$0xff] }
   0xf   : > { %1993 = vmatpush3.msra.mxu0 %v2207_v1  ;;  %2013 = vmatpush3.msra.mxu1 %v2207_v1  ;;  %v1708_v5 = vld [vmem:[%s2243_s29 + $0x40] sm:$0xff]  ;;  %v1709_v7 = vld [vmem:[%s2243_s29 + $0x48] sm:$0xff]  ;;  %v1710_v9 = vld [vmem:[%s2243_s29 + $0x50] sm:$0xff] }
  0x10   : > { %1994 = vmatprep.subr.mxu0 %v2220_v2  ;;  %2014 = vmatprep.subr.mxu1 %v2220_v2  ;;  %v226_v10 = vld [vmem:[%s2243_s29 + $0x18] sm:$0xff]  ;;  %v227_v12 = vld [vmem:[%s2243_s29 + $0x20] sm:$0xff]  ;;  %v228_v14 = vld [vmem:[%s2243_s29 + $0x28] sm:$0xff] }
  0x11   : > { %1995 = vmatpush3.msra.mxu0 %v2220_v2  ;;  %2015 = vmatpush3.msra.mxu1 %v2220_v2  ;;  %v1711_v11 = vld [vmem:[%s2243_s29 + $0x58] sm:$0xff]  ;;  %v1712_v13 = vld [vmem:[%s2243_s29 + $0x60] sm:$0xff]  ;;  %v1713_v15 = vld [vmem:[%s2243_s29 + $0x68] sm:$0xff] }
  0x12   : > { %1996 = vmatprep.subr.mxu0 %v2231_v3  ;;  %2016 = vmatprep.subr.mxu1 %v2231_v3  ;;  %v229_v16 = vld [vmem:[%s2243_s29 + $0x30] sm:$0xff]  ;;  %v230_v18 = vld [vmem:[%s2243_s29 + $0x38] sm:$0xff]  ;;  %v1734_v20 = vld [vmem:[%s2243_s29 + $0x80] sm:$0xff] }
  0x13   : > { %1997 = vmatpush3.msra.mxu0 %v2231_v3  ;;  %1998 = vmatprep.mubr.msk.f32.mxu0 %vm237_vm1, %v223_v4  ;;  %v1714_v17 = vld [vmem:[%s2243_s29 + $0x70] sm:$0xff]  ;;  %v1715_v19 = vld [vmem:[%s2243_s29 + $0x78] sm:$0xff]  ;;  %v1760_v21 = vld [vmem:[%s2243_s29 + $0xc0] sm:$0xff] }
  0x14   : > { %2017 = vmatpush3.msra.mxu1 %v2231_v3  ;;  %2018 = vmatprep.mubr.msk.f32.mxu1 %vm237_vm1, %v1708_v5  ;;  %v1735_v22 = vld [vmem:[%s2243_s29 + $0x88] sm:$0xff]  ;;  %v1736_v24 = vld [vmem:[%s2243_s29 + $0x90] sm:$0xff]  ;;  %v1737_v26 = vld [vmem:[%s2243_s29 + $0x98] sm:$0xff] }
  0x15   : > { %1999 = vmatmul.mubr.msk.f32.vlgmr.msra.gmra.mxu0 %vm237_vm1, %v224_v6  ;;  %2019 = vmatmul.mubr.msk.f32.vlgmr.msra.gmra.mxu1 %vm237_vm1, %v1709_v7  ;;  %v1761_v23 = vld [vmem:[%s2243_s29 + $0xc8] sm:$0xff]  ;;  %v1762_v25 = vld [vmem:[%s2243_s29 + $0xd0] sm:$0xff]  ;;  %v1763_v27 = vld [vmem:[%s2243_s29 + $0xd8] sm:$0xff] }
  0x16   : > { %2030 = vmatprep.subr.msk.mxu0 %vm262_vm0, %v2202_v0  ;;  %2050 = vmatprep.subr.msk.mxu1 %vm262_vm0, %v2202_v0  ;;  %v1738_v28 = vld [vmem:[%s2243_s29 + $0xa0] sm:$0xff]  ;;  %v1739_v30 = vld [vmem:[%s2243_s29 + $0xa8] sm:$0xff]  ;;  %v1740_v32 = vld [vmem:[%s2243_s29 + $0xb0] sm:$0xff] }
  0x17   : > { %2031 = vmatpush3.msk.msra.mxu0 %vm262_vm0, %v2202_v0  ;;  %2051 = vmatpush3.msk.msra.mxu1 %vm262_vm0, %v2202_v0  ;;  %v1764_v29 = vld [vmem:[%s2243_s29 + $0xe0] sm:$0xff]  ;;  %v1765_v31 = vld [vmem:[%s2243_s29 + $0xe8] sm:$0xff]  ;;  %v1766_v33 = vld [vmem:[%s2243_s29 + $0xf0] sm:$0xff] }
  0x18   : > { %2001 = vmatprep.mubr.msk.f32.mxu0 %vm237_vm1, %v225_v8  ;;  %2021 = vmatprep.mubr.msk.f32.mxu1 %vm237_vm1, %v1710_v9  ;;  %v1741_v34 = vld [vmem:[%s2243_s29 + $0xb8] sm:$0xff]  ;;  %v1786_v36 = vld [vmem:[%s2243_s29 + $0x100] sm:$0xff]  ;;  %v1787_v38 = vld [vmem:[%s2243_s29 + $0x108] sm:$0xff] }
  0x19   : > { %2002 = vmatmul.mubr.msk.f32.gmra.mxu0 %vm237_vm1, %v226_v10  ;;  %2022 = vmatmul.mubr.msk.f32.gmra.mxu1 %vm237_vm1, %v1711_v11  ;;  %v1767_v35 = vld [vmem:[%s2243_s29 + $0xf8] sm:$0xff]  ;;  %v1812_v37 = vld [vmem:[%s2243_s29 + $0x140] sm:$0xff]  ;;  %v1813_v39 = vld [vmem:[%s2243_s29 + $0x148] sm:$0xff] }
  0x1a   : > { %2032 = vmatprep.subr.mxu0 %v2207_v1  ;;  %2052 = vmatprep.subr.mxu1 %v2207_v1  ;;  %v1788_v40 = vld [vmem:[%s2243_s29 + $0x110] sm:$0xff]  ;;  %v1789_v42 = vld [vmem:[%s2243_s29 + $0x118] sm:$0xff]  ;;  %v1790_v44 = vld [vmem:[%s2243_s29 + $0x120] sm:$0xff] }
  0x1b   : > { %2033 = vmatpush3.msra.mxu0 %v2207_v1  ;;  %2053 = vmatpush3.msra.mxu1 %v2207_v1  ;;  %v1814_v41 = vld [vmem:[%s2243_s29 + $0x150] sm:$0xff]  ;;  %v1815_v43 = vld [vmem:[%s2243_s29 + $0x158] sm:$0xff]  ;;  %v1816_v45 = vld [vmem:[%s2243_s29 + $0x160] sm:$0xff] }
  0x1c   : > { %2004 = vmatprep.mubr.msk.f32.mxu0 %vm237_vm1, %v227_v12  ;;  %2024 = vmatprep.mubr.msk.f32.mxu1 %vm237_vm1, %v1712_v13  ;;  %v1791_v46 = vld [vmem:[%s2243_s29 + $0x128] sm:$0xff]  ;;  %v1792_v48 = vld [vmem:[%s2243_s29 + $0x130] sm:$0xff]  ;;  %v1793_v50 = vld [vmem:[%s2243_s29 + $0x138] sm:$0xff] }
  0x1d   : > { %2005 = vmatmul.mubr.msk.f32.gmra.mxu0 %vm237_vm1, %v228_v14  ;;  %2025 = vmatmul.mubr.msk.f32.gmra.mxu1 %vm237_vm1, %v1713_v15  ;;  %v1817_v47 = vld [vmem:[%s2243_s29 + $0x168] sm:$0xff]  ;;  %v1818_v49 = vld [vmem:[%s2243_s29 + $0x170] sm:$0xff]  ;;  %v1819_v51 = vld [vmem:[%s2243_s29 + $0x178] sm:$0xff] }
  0x1e   : > { %2034 = vmatprep.subr.mxu0 %v2220_v2  ;;  %2054 = vmatprep.subr.mxu1 %v2220_v2  ;;  %v1838_v52 = vld [vmem:[%s2243_s29 + $0x180] sm:$0xff]  ;;  %v1839_v54 = vld [vmem:[%s2243_s29 + $0x188] sm:$0xff]  ;;  %v1840_v56 = vld [vmem:[%s2243_s29 + $0x190] sm:$0xff] }
  0x1f   : > { %2035 = vmatpush3.msra.mxu0 %v2220_v2  ;;  %2055 = vmatpush3.msra.mxu1 %v2220_v2  ;;  %v1864_v53 = vld [vmem:[%s2243_s29 + $0x1c0] sm:$0xff]  ;;  %v1865_v55 = vld [vmem:[%s2243_s29 + $0x1c8] sm:$0xff]  ;;  %v1866_v57 = vld [vmem:[%s2243_s29 + $0x1d0] sm:$0xff] }
  0x20   : > { %2007 = vmatprep.mubr.msk.f32.mxu0 %vm237_vm1, %v229_v16  ;;  %2027 = vmatprep.mubr.msk.f32.mxu1 %vm237_vm1, %v1714_v17  ;;  %v1841_v58 = vld [vmem:[%s2243_s29 + $0x198] sm:$0xff]  ;;  %v1842_v60 = vld [vmem:[%s2243_s29 + $0x1a0] sm:$0xff]  ;;  %v1843_v62 = vld [vmem:[%s2243_s29 + $0x1a8] sm:$0xff] }
  0x21   : > { %2008 = vmatmul.mubr.msk.f32.gmra.mxu0 %vm237_vm1, %v230_v18  ;;  %2028 = vmatmul.mubr.msk.f32.gmra.mxu1 %vm237_vm1, %v1715_v19  ;;  %v1867_v59 = vld [vmem:[%s2243_s29 + $0x1d8] sm:$0xff]  ;;  %v1868_v61 = vld [vmem:[%s2243_s29 + $0x1e0] sm:$0xff]  ;;  %v1869_v63 = vld [vmem:[%s2243_s29 + $0x1e8] sm:$0xff] }
  0x22   : > { %2036 = vmatprep.subr.mxu0 %v2231_v3  ;;  %2056 = vmatprep.subr.mxu1 %v2231_v3  ;;  %v2440_v4 = vld [vmem:[%s2596_s2] ss:$0 sm:$0xff] }
  0x23   : > { %2037 = vmatpush3.msra.mxu0 %v2231_v3  ;;  %2057 = vmatpush3.msra.mxu1 %v2231_v3 }
  0x24   : > { %2038 = vmatprep.mubr.msk.f32.mxu0 %vm237_vm1, %v1734_v20  ;;  %2058 = vmatprep.mubr.msk.f32.mxu1 %vm237_vm1, %v1760_v21 }
  0x25   : > { %2039 = vmatmul.mubr.msk.f32.vlgmr.msra.gmra.mxu0 %vm237_vm1, %v1735_v22  ;;  %2059 = vmatmul.mubr.msk.f32.vlgmr.msra.gmra.mxu1 %vm237_vm1, %v1761_v23 }
  0x26   : > { %2070 = vmatprep.subr.msk.mxu0 %vm262_vm0, %v2202_v0  ;;  %2090 = vmatprep.subr.msk.mxu1 %vm262_vm0, %v2202_v0 }
  0x27   : > { %2071 = vmatpush3.msk.msra.mxu0 %vm262_vm0, %v2202_v0  ;;  %2091 = vmatpush3.msk.msra.mxu1 %vm262_vm0, %v2202_v0 }
  0x28   : > { %2041 = vmatprep.mubr.msk.f32.mxu0 %vm237_vm1, %v1736_v24  ;;  %2061 = vmatprep.mubr.msk.f32.mxu1 %vm237_vm1, %v1762_v25 }
  0x29   : > { %2042 = vmatmul.mubr.msk.f32.gmra.mxu0 %vm237_vm1, %v1737_v26  ;;  %2062 = vmatmul.mubr.msk.f32.gmra.mxu1 %vm237_vm1, %v1763_v27 }
  0x2a   : > { %2072 = vmatprep.subr.mxu0 %v2207_v1  ;;  %2092 = vmatprep.subr.mxu1 %v2207_v1 }
  0x2b   : > { %2073 = vmatpush3.msra.mxu0 %v2207_v1  ;;  %2093 = vmatpush3.msra.mxu1 %v2207_v1 }
  0x2c   : > { %2044 = vmatprep.mubr.msk.f32.mxu0 %vm237_vm1, %v1738_v28  ;;  %2064 = vmatprep.mubr.msk.f32.mxu1 %vm237_vm1, %v1764_v29 }
  0x2d   : > { %2045 = vmatmul.mubr.msk.f32.gmra.mxu0 %vm237_vm1, %v1739_v30  ;;  %2065 = vmatmul.mubr.msk.f32.gmra.mxu1 %vm237_vm1, %v1765_v31 }
  0x2e   : > { %2074 = vmatprep.subr.mxu0 %v2220_v2  ;;  %2094 = vmatprep.subr.mxu1 %v2220_v2 }
  0x2f   : > { %2075 = vmatpush3.msra.mxu0 %v2220_v2  ;;  %2095 = vmatpush3.msra.mxu1 %v2220_v2 }
  0x30   : > { %2047 = vmatprep.mubr.msk.f32.mxu0 %vm237_vm1, %v1740_v32  ;;  %2067 = vmatprep.mubr.msk.f32.mxu1 %vm237_vm1, %v1766_v33 }
  0x31   : > { %2048 = vmatmul.mubr.msk.f32.gmra.mxu0 %vm237_vm1, %v1741_v34  ;;  %2068 = vmatmul.mubr.msk.f32.gmra.mxu1 %vm237_vm1, %v1767_v35 }
  0x32   : > { %2076 = vmatprep.subr.mxu0 %v2231_v3  ;;  %2096 = vmatprep.subr.mxu1 %v2231_v3 }
  0x33   : > { %2077 = vmatpush3.msra.mxu0 %v2231_v3  ;;  %2097 = vmatpush3.msra.mxu1 %v2231_v3 }
  0x34   : > { %2078 = vmatprep.mubr.msk.f32.mxu0 %vm237_vm1, %v1786_v36  ;;  %2098 = vmatprep.mubr.msk.f32.mxu1 %vm237_vm1, %v1812_v37 }
  0x35   : > { %2079 = vmatmul.mubr.msk.f32.vlgmr.msra.gmra.mxu0 %vm237_vm1, %v1787_v38  ;;  %2099 = vmatmul.mubr.msk.f32.vlgmr.msra.gmra.mxu1 %vm237_vm1, %v1813_v39 }
  0x36   : > { %2110 = vmatprep.subr.msk.mxu0 %vm262_vm0, %v2202_v0  ;;  %2130 = vmatprep.subr.msk.mxu1 %vm262_vm0, %v2202_v0 }
  0x37   : > { %2111 = vmatpush3.msk.msra.mxu0 %vm262_vm0, %v2202_v0  ;;  %2131 = vmatpush3.msk.msra.mxu1 %vm262_vm0, %v2202_v0  ;;  %v1844_v0 = vld [vmem:[%s2243_s29 + $0x1b0] sm:$0xff] }
  0x38   : > { %2081 = vmatprep.mubr.msk.f32.mxu0 %vm237_vm1, %v1788_v40  ;;  %2101 = vmatprep.mubr.msk.f32.mxu1 %vm237_vm1, %v1814_v41 }
  0x39   : > { %2082 = vmatmul.mubr.msk.f32.gmra.mxu0 %vm237_vm1, %v1789_v42  ;;  %2102 = vmatmul.mubr.msk.f32.gmra.mxu1 %vm237_vm1, %v1815_v43 }
  0x3a   : > { %2112 = vmatprep.subr.mxu0 %v2207_v1  ;;  %2132 = vmatprep.subr.mxu1 %v2207_v1 }
  0x3b   : > { %2113 = vmatpush3.msra.mxu0 %v2207_v1  ;;  %2133 = vmatpush3.msra.mxu1 %v2207_v1  ;;  %v1870_v1 = vld [vmem:[%s2243_s29 + $0x1f0] sm:$0xff] }
  0x3c   : > { %2084 = vmatprep.mubr.msk.f32.mxu0 %vm237_vm1, %v1790_v44  ;;  %2104 = vmatprep.mubr.msk.f32.mxu1 %vm237_vm1, %v1816_v45 }
  0x3d   : > { %2085 = vmatmul.mubr.msk.f32.gmra.mxu0 %vm237_vm1, %v1791_v46  ;;  %2105 = vmatmul.mubr.msk.f32.gmra.mxu1 %vm237_vm1, %v1817_v47 }
  0x3e   : > { %2114 = vmatprep.subr.mxu0 %v2220_v2  ;;  %2134 = vmatprep.subr.mxu1 %v2220_v2 }
  0x3f   : > { %2115 = vmatpush3.msra.mxu0 %v2220_v2  ;;  %2135 = vmatpush3.msra.mxu1 %v2220_v2  ;;  %v1845_v2 = vld [vmem:[%s2243_s29 + $0x1b8] sm:$0xff] }
  0x40   : > { %2087 = vmatprep.mubr.msk.f32.mxu0 %vm237_vm1, %v1792_v48  ;;  %2107 = vmatprep.mubr.msk.f32.mxu1 %vm237_vm1, %v1818_v49 }
  0x41   : > { %2088 = vmatmul.mubr.msk.f32.gmra.mxu0 %vm237_vm1, %v1793_v50  ;;  %2108 = vmatmul.mubr.msk.f32.gmra.mxu1 %vm237_vm1, %v1819_v51 }
  0x42   : > { %2116 = vmatprep.subr.mxu0 %v2231_v3  ;;  %2136 = vmatprep.subr.mxu1 %v2231_v3 }
  0x43   : > { %2117 = vmatpush3.msra.mxu0 %v2231_v3  ;;  %2137 = vmatpush3.msra.mxu1 %v2231_v3  ;;  %v1871_v3 = vld [vmem:[%s2243_s29 + $0x1f8] sm:$0xff] }
  0x44   : > { %2118 = vmatprep.mubr.msk.f32.mxu0 %vm237_vm1, %v1838_v52  ;;  %2138 = vmatprep.mubr.msk.f32.mxu1 %vm237_vm1, %v1864_v53 }
  0x45   : > { %2119 = vmatmul.mubr.msk.f32.vlgmr.msra.gmra.mxu0 %vm237_vm1, %v1839_v54  ;;  %2139 = vmatmul.mubr.msk.f32.vlgmr.msra.gmra.mxu1 %vm237_vm1, %v1865_v55 }
  0x46   : > { %2121 = vmatprep.mubr.msk.f32.mxu0 %vm237_vm1, %v1840_v56  ;;  %2141 = vmatprep.mubr.msk.f32.mxu1 %vm237_vm1, %v1866_v57 }
  0x49   : > { %2122 = vmatmul.mubr.msk.f32.gmra.mxu0 %vm237_vm1, %v1841_v58  ;;  %2142 = vmatmul.mubr.msk.f32.gmra.mxu1 %vm237_vm1, %v1867_v59 }
  0x4a   : > { %2124 = vmatprep.mubr.msk.f32.mxu0 %vm237_vm1, %v1842_v60  ;;  %2144 = vmatprep.mubr.msk.f32.mxu1 %vm237_vm1, %v1868_v61 }
  0x4d   : > { %2125 = vmatmul.mubr.msk.f32.gmra.mxu0 %vm237_vm1, %v1843_v62  ;;  %2145 = vmatmul.mubr.msk.f32.gmra.mxu1 %vm237_vm1, %v1869_v63 }
  0x4e   : > { %2127 = vmatprep.mubr.msk.f32.mxu0 %vm237_vm1, %v1844_v0  ;;  %2147 = vmatprep.mubr.msk.f32.mxu1 %vm237_vm1, %v1870_v1 }
  0x51   : > { %2128 = vmatmul.mubr.msk.f32.gmra.mxu0 %vm237_vm1, %v1845_v2  ;;  %2148 = vmatmul.mubr.msk.f32.gmra.mxu1 %vm237_vm1, %v1871_v3 }
  0xd5   : > { %v2000_v5 = vpop.f32.mrf.mxu0  ;;  %v2020_v6 = vpop.f32.mrf.mxu1 }
  0xd6   : > { %v338_v7 = vadd.f32 %v2000_v5, %v2440_v4  ;;  %v508_v8 = vadd.f32 %v2020_v6, %v2440_v4 }
  0xd7   : > { %v332_v9 = vpop.f32.mrf.mxu0  ;;  %v502_v10 = vpop.f32.mrf.mxu1 }
  0xd8   : > { %v372_v11 = vmax.f32 %v338_v7, 0.0  ;;  %v542_v12 = vmax.f32 %v508_v8, 0.0  ;;  %v333_v13 = vadd.f32 %v2440_v4, %v332_v9  ;;  %v503_v14 = vadd.f32 %v2440_v4, %v502_v10 }
  0xd9   : > { %v2003_v15 = vpop.f32.mrf.mxu0  ;;  %v2023_v16 = vpop.f32.mrf.mxu1 }
  0xda   : > { %380 = vst [vmem:[%s2449_s8 + $0x8] sm:$0xff] %v372_v11  ;;  %1726 = vst [vmem:[%s2449_s8 + $0x48] sm:$0xff] %v542_v12  ;;  %v371_v17 = vmax.f32 %v333_v13, 0.0  ;;  %v541_v18 = vmax.f32 %v503_v14, 0.0  ;;  %v348_v19 = vadd.f32 %v2003_v15, %v2440_v4  ;;  %v518_v20 = vadd.f32 %v2023_v16, %v2440_v4 }
  0xdb   : > { %v342_v21 = vpop.f32.mrf.mxu0  ;;  %v512_v22 = vpop.f32.mrf.mxu1 }
  0xdc   : > { %379 = vst [vmem:[%s2449_s8] sm:$0xff] %v371_v17  ;;  %1725 = vst [vmem:[%s2449_s8 + $0x40] sm:$0xff] %v541_v18  ;;  %v374_v23 = vmax.f32 %v348_v19, 0.0  ;;  %v544_v24 = vmax.f32 %v518_v20, 0.0  ;;  %v343_v25 = vadd.f32 %v2440_v4, %v342_v21  ;;  %v513_v26 = vadd.f32 %v2440_v4, %v512_v22 }
  0xdd   : > { %v2006_v27 = vpop.f32.mrf.mxu0  ;;  %v2026_v28 = vpop.f32.mrf.mxu1  ;;  %v387_v31 = vadd.f32 %v372_v11, %v371_v17  ;;  %v558_v32 = vadd.f32 %v542_v12, %v541_v18 }
  0xde   : > { %382 = vst [vmem:[%s2449_s8 + $0x18] sm:$0xff] %v374_v23  ;;  %1728 = vst [vmem:[%s2449_s8 + $0x58] sm:$0xff] %v544_v24  ;;  %v358_v29 = vadd.f32 %v2006_v27, %v2440_v4  ;;  %v528_v30 = vadd.f32 %v2026_v28, %v2440_v4  ;;  %v373_v33 = vmax.f32 %v343_v25, 0.0  ;;  %v543_v34 = vmax.f32 %v513_v26, 0.0 }
  0xdf   : > { %v352_v35 = vpop.f32.mrf.mxu0  ;;  %v522_v36 = vpop.f32.mrf.mxu1 }
  0xe0   : > { %v376_v37 = vmax.f32 %v358_v29, 0.0  ;;  %v546_v38 = vmax.f32 %v528_v30, 0.0  ;;  %v353_v39 = vadd.f32 %v2440_v4, %v352_v35  ;;  %v523_v40 = vadd.f32 %v2440_v4, %v522_v36  ;;  %381 = vst [vmem:[%s2449_s8 + $0x10] sm:$0xff] %v373_v33  ;;  %1727 = vst [vmem:[%s2449_s8 + $0x50] sm:$0xff] %v543_v34 }
  0xe1   : > { %v388_v41 = vadd.f32 %v387_v31, %v373_v33  ;;  %v559_v42 = vadd.f32 %v558_v32, %v543_v34  ;;  %v2009_v43 = vpop.f32.mrf.mxu0  ;;  %v2029_v44 = vpop.f32.mrf.mxu1 }
  0xe2   : > { %384 = vst [vmem:[%s2449_s8 + $0x28] sm:$0xff] %v376_v37  ;;  %1730 = vst [vmem:[%s2449_s8 + $0x68] sm:$0xff] %v546_v38  ;;  %v375_v45 = vmax.f32 %v353_v39, 0.0  ;;  %v545_v46 = vmax.f32 %v523_v40, 0.0  ;;  %v368_v47 = vadd.f32 %v2009_v43, %v2440_v4  ;;  %v538_v48 = vadd.f32 %v2029_v44, %v2440_v4 }
  0xe3   : > { %v389_v49 = vadd.f32 %v388_v41, %v374_v23  ;;  %v560_v50 = vadd.f32 %v559_v42, %v544_v24  ;;  %v362_v51 = vpop.f32.mrf.mxu0  ;;  %v532_v52 = vpop.f32.mrf.mxu1 }
  0xe4   : > { %383 = vst [vmem:[%s2449_s8 + $0x20] sm:$0xff] %v375_v45  ;;  %1729 = vst [vmem:[%s2449_s8 + $0x60] sm:$0xff] %v545_v46  ;;  %v378_v53 = vmax.f32 %v368_v47, 0.0  ;;  %v548_v54 = vmax.f32 %v538_v48, 0.0  ;;  %v363_v55 = vadd.f32 %v2440_v4, %v362_v51  ;;  %v533_v56 = vadd.f32 %v2440_v4, %v532_v52 }
  0xe5   : > { %v390_v57 = vadd.f32 %v389_v49, %v375_v45  ;;  %v561_v58 = vadd.f32 %v560_v50, %v545_v46  ;;  %v2040_v59 = vpop.f32.mrf.mxu0  ;;  %v2060_v60 = vpop.f32.mrf.mxu1 }
  0xe6   : > { %386 = vst [vmem:[%s2449_s8 + $0x38] sm:$0xff] %v378_v53  ;;  %1732 = vst [vmem:[%s2449_s8 + $0x78] sm:$0xff] %v548_v54  ;;  %v377_v61 = vmax.f32 %v363_v55, 0.0  ;;  %v547_v62 = vmax.f32 %v533_v56, 0.0  ;;  %v679_v63 = vadd.f32 %v2040_v59, %v2440_v4  ;;  %v850_v0 = vadd.f32 %v2060_v60, %v2440_v4 }
  0xe7   : > { %v391_v1 = vadd.f32 %v390_v57, %v376_v37  ;;  %v562_v2 = vadd.f32 %v561_v58, %v546_v38  ;;  %v673_v3 = vpop.f32.mrf.mxu0  ;;  %v844_v5 = vpop.f32.mrf.mxu1 }
  0xe8   : > { %385 = vst [vmem:[%s2449_s8 + $0x30] sm:$0xff] %v377_v61  ;;  %1731 = vst [vmem:[%s2449_s8 + $0x70] sm:$0xff] %v547_v62  ;;  %v713_v6 = vmax.f32 %v679_v63, 0.0  ;;  %v884_v7 = vmax.f32 %v850_v0, 0.0  ;;  %v674_v8 = vadd.f32 %v2440_v4, %v673_v3  ;;  %v845_v9 = vadd.f32 %v2440_v4, %v844_v5 }
  0xe9   : > { %v392_v10 = vadd.f32 %v391_v1, %v377_v61  ;;  %v563_v11 = vadd.f32 %v562_v2, %v547_v62  ;;  %v2043_v12 = vpop.f32.mrf.mxu0  ;;  %v2063_v13 = vpop.f32.mrf.mxu1 }
  0xea   : > { %1752 = vst [vmem:[%s2449_s8 + $0x88] sm:$0xff] %v713_v6  ;;  %1778 = vst [vmem:[%s2449_s8 + $0xc8] sm:$0xff] %v884_v7  ;;  %v712_v14 = vmax.f32 %v674_v8, 0.0  ;;  %v883_v15 = vmax.f32 %v845_v9, 0.0  ;;  %v689_v16 = vadd.f32 %v2043_v12, %v2440_v4  ;;  %v860_v17 = vadd.f32 %v2063_v13, %v2440_v4 }
  0xeb   : > { %v393_v18 = vadd.f32 %v392_v10, %v378_v53  ;;  %v564_v19 = vadd.f32 %v563_v11, %v548_v54  ;;  %v683_v20 = vpop.f32.mrf.mxu0  ;;  %v854_v21 = vpop.f32.mrf.mxu1 }
  0xec   : > { %1751 = vst [vmem:[%s2449_s8 + $0x80] sm:$0xff] %v712_v14  ;;  %1777 = vst [vmem:[%s2449_s8 + $0xc0] sm:$0xff] %v883_v15  ;;  %v715_v22 = vmax.f32 %v689_v16, 0.0  ;;  %v886_v23 = vmax.f32 %v860_v17, 0.0  ;;  %v684_v26 = vadd.f32 %v2440_v4, %v683_v20  ;;  %v855_v27 = vadd.f32 %v2440_v4, %v854_v21 }
  0xed   : > { %v394_v24 = vrot.slane %v393_v18, 4  ;;  %v565_v25 = vrot.slane %v564_v19, 4  ;;  %v2046_v28 = vpop.f32.mrf.mxu0  ;;  %v2066_v29 = vpop.f32.mrf.mxu1  ;;  %v729_v30 = vadd.f32 %v713_v6, %v712_v14  ;;  %v900_v31 = vadd.f32 %v884_v7, %v883_v15 }
  0xee   : > { %1754 = vst [vmem:[%s2449_s8 + $0x98] sm:$0xff] %v715_v22  ;;  %1780 = vst [vmem:[%s2449_s8 + $0xd8] sm:$0xff] %v886_v23  ;;  %v699_v32 = vadd.f32 %v2046_v28, %v2440_v4  ;;  %v870_v33 = vadd.f32 %v2066_v29, %v2440_v4  ;;  %v714_v36 = vmax.f32 %v684_v26, 0.0  ;;  %v885_v37 = vmax.f32 %v855_v27, 0.0 }
  0xef   : > { %v395_v34 = vadd.f32 %v394_v24, %v393_v18  ;;  %v566_v35 = vadd.f32 %v565_v25, %v564_v19  ;;  %v693_v38 = vpop.f32.mrf.mxu0  ;;  %v864_v39 = vpop.f32.mrf.mxu1 }
  0xf0   : > { %v717_v40 = vmax.f32 %v699_v32, 0.0  ;;  %v888_v41 = vmax.f32 %v870_v33, 0.0  ;;  %v694_v42 = vadd.f32 %v2440_v4, %v693_v38  ;;  %v865_v43 = vadd.f32 %v2440_v4, %v864_v39  ;;  %1753 = vst [vmem:[%s2449_s8 + $0x90] sm:$0xff] %v714_v36  ;;  %1779 = vst [vmem:[%s2449_s8 + $0xd0] sm:$0xff] %v885_v37 }
  0xf1   : > { %v396_v44 = vrot.slane %v395_v34, 2  ;;  %v567_v45 = vrot.slane %v566_v35, 2  ;;  %v730_v46 = vadd.f32 %v729_v30, %v714_v36  ;;  %v901_v47 = vadd.f32 %v900_v31, %v885_v37  ;;  %v2049_v48 = vpop.f32.mrf.mxu0  ;;  %v2069_v49 = vpop.f32.mrf.mxu1 }
  0xf2   : > { %1756 = vst [vmem:[%s2449_s8 + $0xa8] sm:$0xff] %v717_v40  ;;  %1782 = vst [vmem:[%s2449_s8 + $0xe8] sm:$0xff] %v888_v41  ;;  %v716_v50 = vmax.f32 %v694_v42, 0.0  ;;  %v887_v51 = vmax.f32 %v865_v43, 0.0  ;;  %v709_v52 = vadd.f32 %v2049_v48, %v2440_v4  ;;  %v880_v53 = vadd.f32 %v2069_v49, %v2440_v4 }
  0xf3   : > { %v397_v54 = vadd.f32 %v396_v44, %v395_v34  ;;  %v568_v55 = vadd.f32 %v567_v45, %v566_v35  ;;  %v731_v56 = vadd.f32 %v730_v46, %v715_v22  ;;  %v902_v57 = vadd.f32 %v901_v47, %v886_v23  ;;  %v703_v58 = vpop.f32.mrf.mxu0  ;;  %v874_v59 = vpop.f32.mrf.mxu1 }
  0xf4   : > { %1755 = vst [vmem:[%s2449_s8 + $0xa0] sm:$0xff] %v716_v50  ;;  %1781 = vst [vmem:[%s2449_s8 + $0xe0] sm:$0xff] %v887_v51  ;;  %v719_v60 = vmax.f32 %v709_v52, 0.0  ;;  %v890_v61 = vmax.f32 %v880_v53, 0.0  ;;  %v704_v62 = vadd.f32 %v2440_v4, %v703_v58  ;;  %v875_v63 = vadd.f32 %v2440_v4, %v874_v59 }
  0xf5   : > { %v398_v0 = vrot.slane %v397_v54, 1  ;;  %v569_v1 = vrot.slane %v568_v55, 1  ;;  %v732_v2 = vadd.f32 %v731_v56, %v716_v50  ;;  %v903_v3 = vadd.f32 %v902_v57, %v887_v51  ;;  %v2080_v5 = vpop.f32.mrf.mxu0  ;;  %v2100_v6 = vpop.f32.mrf.mxu1 }
  0xf6   : > { %1758 = vst [vmem:[%s2449_s8 + $0xb8] sm:$0xff] %v719_v60  ;;  %1784 = vst [vmem:[%s2449_s8 + $0xf8] sm:$0xff] %v890_v61  ;;  %v718_v7 = vmax.f32 %v704_v62, 0.0  ;;  %v889_v8 = vmax.f32 %v875_v63, 0.0  ;;  %v1021_v9 = vadd.f32 %v2080_v5, %v2440_v4  ;;  %v1192_v10 = vadd.f32 %v2100_v6, %v2440_v4 }
  0xf7   : > { %v399_v11 = vadd.f32 %v398_v0, %v397_v54  ;;  %v570_v12 = vadd.f32 %v569_v1, %v568_v55  ;;  %v733_v13 = vadd.f32 %v732_v2, %v717_v40  ;;  %v904_v14 = vadd.f32 %v903_v3, %v888_v41  ;;  %v1015_v15 = vpop.f32.mrf.mxu0  ;;  %v1186_v16 = vpop.f32.mrf.mxu1 }
  0xf8   : > { %1757 = vst [vmem:[%s2449_s8 + $0xb0] sm:$0xff] %v718_v7  ;;  %1783 = vst [vmem:[%s2449_s8 + $0xf0] sm:$0xff] %v889_v8  ;;  %v1055_v17 = vmax.f32 %v1021_v9, 0.0  ;;  %v1226_v18 = vmax.f32 %v1192_v10, 0.0  ;;  %v1016_v19 = vadd.f32 %v2440_v4, %v1015_v15  ;;  %v1187_v20 = vadd.f32 %v2440_v4, %v1186_v16 }
  0xf9   : > { %v401_v21 = vmul.f32 0.015625, %v399_v11  ;;  %v571_v22 = vmul.f32 0.015625, %v570_v12  ;;  %v734_v23 = vadd.f32 %v733_v13, %v718_v7  ;;  %v905_v24 = vadd.f32 %v904_v14, %v889_v8  ;;  %v2083_v25 = vpop.f32.mrf.mxu0  ;;  %v2103_v26 = vpop.f32.mrf.mxu1 }
  0xfa   : > { %1804 = vst [vmem:[%s2449_s8 + $0x108] sm:$0xff] %v1055_v17  ;;  %1830 = vst [vmem:[%s2449_s8 + $0x148] sm:$0xff] %v1226_v18  ;;  %v1054_v27 = vmax.f32 %v1016_v19, 0.0  ;;  %v1225_v28 = vmax.f32 %v1187_v20, 0.0  ;;  %v1031_v29 = vadd.f32 %v2083_v25, %v2440_v4  ;;  %v1202_v30 = vadd.f32 %v2103_v26, %v2440_v4 }
  0xfb   : > { %402 = vst [vmem:[%s2517_s11] sm:$0x1] %v401_v21  ;;  %1733 = vst [vmem:[%s2517_s11 + $0x1] sm:$0x1] %v571_v22  ;;  %v735_v31 = vadd.f32 %v734_v23, %v719_v60  ;;  %v906_v32 = vadd.f32 %v905_v24, %v890_v61  ;;  %v1025_v33 = vpop.f32.mrf.mxu0  ;;  %v1196_v34 = vpop.f32.mrf.mxu1 }
  0xfc   : > { %1803 = vst [vmem:[%s2449_s8 + $0x100] sm:$0xff] %v1054_v27  ;;  %1829 = vst [vmem:[%s2449_s8 + $0x140] sm:$0xff] %v1225_v28  ;;  %v1057_v35 = vmax.f32 %v1031_v29, 0.0  ;;  %v1228_v36 = vmax.f32 %v1202_v30, 0.0  ;;  %v1026_v39 = vadd.f32 %v2440_v4, %v1025_v33  ;;  %v1197_v40 = vadd.f32 %v2440_v4, %v1196_v34 }
  0xfd   : > { %v736_v37 = vrot.slane %v735_v31, 4  ;;  %v907_v38 = vrot.slane %v906_v32, 4  ;;  %v2086_v41 = vpop.f32.mrf.mxu0  ;;  %v2106_v42 = vpop.f32.mrf.mxu1  ;;  %v1071_v43 = vadd.f32 %v1055_v17, %v1054_v27  ;;  %v1242_v44 = vadd.f32 %v1226_v18, %v1225_v28 }
  0xfe   : > { %1806 = vst [vmem:[%s2449_s8 + $0x118] sm:$0xff] %v1057_v35  ;;  %1832 = vst [vmem:[%s2449_s8 + $0x158] sm:$0xff] %v1228_v36  ;;  %v1041_v45 = vadd.f32 %v2086_v41, %v2440_v4  ;;  %v1212_v46 = vadd.f32 %v2106_v42, %v2440_v4  ;;  %v1056_v49 = vmax.f32 %v1026_v39, 0.0  ;;  %v1227_v50 = vmax.f32 %v1197_v40, 0.0 }
  0xff   : > { %v737_v47 = vadd.f32 %v736_v37, %v735_v31  ;;  %v908_v48 = vadd.f32 %v907_v38, %v906_v32  ;;  %v1035_v51 = vpop.f32.mrf.mxu0  ;;  %v1206_v52 = vpop.f32.mrf.mxu1 }
 0x100   : > { %v1059_v53 = vmax.f32 %v1041_v45, 0.0  ;;  %v1230_v54 = vmax.f32 %v1212_v46, 0.0  ;;  %v1036_v55 = vadd.f32 %v2440_v4, %v1035_v51  ;;  %v1207_v56 = vadd.f32 %v2440_v4, %v1206_v52  ;;  %1805 = vst [vmem:[%s2449_s8 + $0x110] sm:$0xff] %v1056_v49  ;;  %1831 = vst [vmem:[%s2449_s8 + $0x150] sm:$0xff] %v1227_v50 }
 0x101   : > { %v738_v57 = vrot.slane %v737_v47, 2  ;;  %v909_v58 = vrot.slane %v908_v48, 2  ;;  %v1072_v59 = vadd.f32 %v1071_v43, %v1056_v49  ;;  %v1243_v60 = vadd.f32 %v1242_v44, %v1227_v50  ;;  %v2089_v61 = vpop.f32.mrf.mxu0  ;;  %v2109_v62 = vpop.f32.mrf.mxu1 }
 0x102   : > { %1808 = vst [vmem:[%s2449_s8 + $0x128] sm:$0xff] %v1059_v53  ;;  %1834 = vst [vmem:[%s2449_s8 + $0x168] sm:$0xff] %v1230_v54  ;;  %v1058_v63 = vmax.f32 %v1036_v55, 0.0  ;;  %v1229_v0 = vmax.f32 %v1207_v56, 0.0  ;;  %v1051_v1 = vadd.f32 %v2089_v61, %v2440_v4  ;;  %v1222_v2 = vadd.f32 %v2109_v62, %v2440_v4 }
 0x103   : > { %v739_v3 = vadd.f32 %v738_v57, %v737_v47  ;;  %v910_v5 = vadd.f32 %v909_v58, %v908_v48  ;;  %v1073_v6 = vadd.f32 %v1072_v59, %v1057_v35  ;;  %v1244_v7 = vadd.f32 %v1243_v60, %v1228_v36  ;;  %v1045_v8 = vpop.f32.mrf.mxu0  ;;  %v1216_v9 = vpop.f32.mrf.mxu1 }
 0x104   : > { %1807 = vst [vmem:[%s2449_s8 + $0x120] sm:$0xff] %v1058_v63  ;;  %1833 = vst [vmem:[%s2449_s8 + $0x160] sm:$0xff] %v1229_v0  ;;  %v1061_v10 = vmax.f32 %v1051_v1, 0.0  ;;  %v1232_v11 = vmax.f32 %v1222_v2, 0.0  ;;  %v1046_v12 = vadd.f32 %v2440_v4, %v1045_v8  ;;  %v1217_v13 = vadd.f32 %v2440_v4, %v1216_v9 }
 0x105   : > { %v740_v14 = vrot.slane %v739_v3, 1  ;;  %v911_v15 = vrot.slane %v910_v5, 1  ;;  %v1074_v16 = vadd.f32 %v1073_v6, %v1058_v63  ;;  %v1245_v17 = vadd.f32 %v1244_v7, %v1229_v0  ;;  %v2120_v18 = vpop.f32.mrf.mxu0  ;;  %v2140_v19 = vpop.f32.mrf.mxu1 }
 0x106   : > { %1810 = vst [vmem:[%s2449_s8 + $0x138] sm:$0xff] %v1061_v10  ;;  %1836 = vst [vmem:[%s2449_s8 + $0x178] sm:$0xff] %v1232_v11  ;;  %v1060_v20 = vmax.f32 %v1046_v12, 0.0  ;;  %v1231_v21 = vmax.f32 %v1217_v13, 0.0  ;;  %v1363_v22 = vadd.f32 %v2120_v18, %v2440_v4  ;;  %v1534_v23 = vadd.f32 %v2140_v19, %v2440_v4 }
 0x107   : > { %v741_v24 = vadd.f32 %v740_v14, %v739_v3  ;;  %v912_v25 = vadd.f32 %v911_v15, %v910_v5  ;;  %v1075_v26 = vadd.f32 %v1074_v16, %v1059_v53  ;;  %v1246_v27 = vadd.f32 %v1245_v17, %v1230_v54  ;;  %v1357_v28 = vpop.f32.mrf.mxu0  ;;  %v1528_v29 = vpop.f32.mrf.mxu1 }
 0x108   : > { %1809 = vst [vmem:[%s2449_s8 + $0x130] sm:$0xff] %v1060_v20  ;;  %1835 = vst [vmem:[%s2449_s8 + $0x170] sm:$0xff] %v1231_v21  ;;  %v1397_v30 = vmax.f32 %v1363_v22, 0.0  ;;  %v1568_v31 = vmax.f32 %v1534_v23, 0.0  ;;  %v1358_v32 = vadd.f32 %v2440_v4, %v1357_v28  ;;  %v1529_v33 = vadd.f32 %v2440_v4, %v1528_v29 }
 0x109   : > { %v742_v34 = vmul.f32 0.015625, %v741_v24  ;;  %v913_v35 = vmul.f32 0.015625, %v912_v25  ;;  %v1076_v36 = vadd.f32 %v1075_v26, %v1060_v20  ;;  %v1247_v37 = vadd.f32 %v1246_v27, %v1231_v21  ;;  %v2123_v38 = vpop.f32.mrf.mxu0  ;;  %v2143_v39 = vpop.f32.mrf.mxu1 }
 0x10a   : > { %1856 = vst [vmem:[%s2449_s8 + $0x188] sm:$0xff] %v1397_v30  ;;  %1882 = vst [vmem:[%s2449_s8 + $0x1c8] sm:$0xff] %v1568_v31  ;;  %v1396_v40 = vmax.f32 %v1358_v32, 0.0  ;;  %v1567_v41 = vmax.f32 %v1529_v33, 0.0  ;;  %v1373_v42 = vadd.f32 %v2123_v38, %v2440_v4  ;;  %v1544_v43 = vadd.f32 %v2143_v39, %v2440_v4 }
 0x10b   : > { %1759 = vst [vmem:[%s2517_s11 + $0x2] sm:$0x1] %v742_v34  ;;  %1785 = vst [vmem:[%s2517_s11 + $0x3] sm:$0x1] %v913_v35  ;;  %v1077_v44 = vadd.f32 %v1076_v36, %v1061_v10  ;;  %v1248_v45 = vadd.f32 %v1247_v37, %v1232_v11  ;;  %v1367_v46 = vpop.f32.mrf.mxu0  ;;  %v1538_v47 = vpop.f32.mrf.mxu1 }
 0x10c   : > { %1855 = vst [vmem:[%s2449_s8 + $0x180] sm:$0xff] %v1396_v40  ;;  %1881 = vst [vmem:[%s2449_s8 + $0x1c0] sm:$0xff] %v1567_v41  ;;  %v1399_v48 = vmax.f32 %v1373_v42, 0.0  ;;  %v1570_v49 = vmax.f32 %v1544_v43, 0.0  ;;  %v1368_v52 = vadd.f32 %v2440_v4, %v1367_v46  ;;  %v1539_v53 = vadd.f32 %v2440_v4, %v1538_v47 }
 0x10d   : > { %v1078_v50 = vrot.slane %v1077_v44, 4  ;;  %v1249_v51 = vrot.slane %v1248_v45, 4  ;;  %v2126_v54 = vpop.f32.mrf.mxu0  ;;  %v2146_v55 = vpop.f32.mrf.mxu1  ;;  %v1413_v56 = vadd.f32 %v1397_v30, %v1396_v40  ;;  %v1584_v57 = vadd.f32 %v1568_v31, %v1567_v41 }
 0x10e   : > { %1858 = vst [vmem:[%s2449_s8 + $0x198] sm:$0xff] %v1399_v48  ;;  %1884 = vst [vmem:[%s2449_s8 + $0x1d8] sm:$0xff] %v1570_v49  ;;  %v1383_v58 = vadd.f32 %v2126_v54, %v2440_v4  ;;  %v1554_v59 = vadd.f32 %v2146_v55, %v2440_v4  ;;  %v1398_v62 = vmax.f32 %v1368_v52, 0.0  ;;  %v1569_v63 = vmax.f32 %v1539_v53, 0.0 }
 0x10f   : > { %v1079_v60 = vadd.f32 %v1078_v50, %v1077_v44  ;;  %v1250_v61 = vadd.f32 %v1249_v51, %v1248_v45  ;;  %v1377_v0 = vpop.f32.mrf.mxu0  ;;  %v1548_v1 = vpop.f32.mrf.mxu1 }
 0x110   : > { %v1401_v2 = vmax.f32 %v1383_v58, 0.0  ;;  %v1572_v3 = vmax.f32 %v1554_v59, 0.0  ;;  %v1378_v5 = vadd.f32 %v2440_v4, %v1377_v0  ;;  %v1549_v6 = vadd.f32 %v2440_v4, %v1548_v1  ;;  %1857 = vst [vmem:[%s2449_s8 + $0x190] sm:$0xff] %v1398_v62  ;;  %1883 = vst [vmem:[%s2449_s8 + $0x1d0] sm:$0xff] %v1569_v63 }
 0x111   : > { %v1080_v7 = vrot.slane %v1079_v60, 2  ;;  %v1251_v8 = vrot.slane %v1250_v61, 2  ;;  %v1414_v9 = vadd.f32 %v1413_v56, %v1398_v62  ;;  %v1585_v10 = vadd.f32 %v1584_v57, %v1569_v63  ;;  %v2129_v11 = vpop.f32.mrf.mxu0  ;;  %v2149_v12 = vpop.f32.mrf.mxu1 }
 0x112   : > { %1860 = vst [vmem:[%s2449_s8 + $0x1a8] sm:$0xff] %v1401_v2  ;;  %1886 = vst [vmem:[%s2449_s8 + $0x1e8] sm:$0xff] %v1572_v3  ;;  %v1400_v13 = vmax.f32 %v1378_v5, 0.0  ;;  %v1571_v14 = vmax.f32 %v1549_v6, 0.0  ;;  %v1393_v15 = vadd.f32 %v2129_v11, %v2440_v4  ;;  %v1564_v16 = vadd.f32 %v2149_v12, %v2440_v4 }
 0x113   : > { %v1081_v17 = vadd.f32 %v1080_v7, %v1079_v60  ;;  %v1252_v18 = vadd.f32 %v1251_v8, %v1250_v61  ;;  %v1415_v19 = vadd.f32 %v1414_v9, %v1399_v48  ;;  %v1586_v20 = vadd.f32 %v1585_v10, %v1570_v49  ;;  %v1387_v21 = vpop.f32.mrf.mxu0  ;;  %v1558_v22 = vpop.f32.mrf.mxu1 }
 0x114   : > { %1859 = vst [vmem:[%s2449_s8 + $0x1a0] sm:$0xff] %v1400_v13  ;;  %1885 = vst [vmem:[%s2449_s8 + $0x1e0] sm:$0xff] %v1571_v14  ;;  %v1403_v23 = vmax.f32 %v1393_v15, 0.0  ;;  %v1574_v24 = vmax.f32 %v1564_v16, 0.0  ;;  %v1388_v25 = vadd.f32 %v2440_v4, %v1387_v21  ;;  %v1559_v26 = vadd.f32 %v2440_v4, %v1558_v22 }
 0x115   : > { %v1082_v27 = vrot.slane %v1081_v17, 1  ;;  %v1253_v28 = vrot.slane %v1252_v18, 1  ;;  %v1416_v29 = vadd.f32 %v1415_v19, %v1400_v13  ;;  %v1587_v30 = vadd.f32 %v1586_v20, %v1571_v14 }
 0x116   : > { %1862 = vst [vmem:[%s2449_s8 + $0x1b8] sm:$0xff] %v1403_v23  ;;  %1888 = vst [vmem:[%s2449_s8 + $0x1f8] sm:$0xff] %v1574_v24  ;;  %v1402_v31 = vmax.f32 %v1388_v25, 0.0  ;;  %v1573_v32 = vmax.f32 %v1559_v26, 0.0 }
 0x117   : > { %v1083_v33 = vadd.f32 %v1082_v27, %v1081_v17  ;;  %v1254_v34 = vadd.f32 %v1253_v28, %v1252_v18  ;;  %v1417_v35 = vadd.f32 %v1416_v29, %v1401_v2  ;;  %v1588_v36 = vadd.f32 %v1587_v30, %v1572_v3 }
 0x118   : > { %1861 = vst [vmem:[%s2449_s8 + $0x1b0] sm:$0xff] %v1402_v31  ;;  %1887 = vst [vmem:[%s2449_s8 + $0x1f0] sm:$0xff] %v1573_v32 }
 0x119   : > { %v1084_v37 = vmul.f32 0.015625, %v1083_v33  ;;  %v1255_v38 = vmul.f32 0.015625, %v1254_v34  ;;  %v1418_v39 = vadd.f32 %v1417_v35, %v1402_v31  ;;  %v1589_v4 = vadd.f32 %v1588_v36, %v1573_v32 }
 0x11b   : > { %1811 = vst [vmem:[%s2517_s11 + $0x4] sm:$0x1] %v1084_v37  ;;  %1837 = vst [vmem:[%s2517_s11 + $0x5] sm:$0x1] %v1255_v38  ;;  %v1419_v40 = vadd.f32 %v1418_v39, %v1403_v23  ;;  %v1590_v41 = vadd.f32 %v1589_v4, %v1574_v24 }
 0x11d   : > { %v1420_v42 = vrot.slane %v1419_v40, 4  ;;  %v1591_v43 = vrot.slane %v1590_v41, 4 }
 0x11f   : > { %v1421_v44 = vadd.f32 %v1420_v42, %v1419_v40  ;;  %v1592_v45 = vadd.f32 %v1591_v43, %v1590_v41 }
 0x121   : > { %v1422_v46 = vrot.slane %v1421_v44, 2  ;;  %v1593_v47 = vrot.slane %v1592_v45, 2 }
 0x123   : > { %v1423_v48 = vadd.f32 %v1422_v46, %v1421_v44  ;;  %v1594_v49 = vadd.f32 %v1593_v47, %v1592_v45 }
 0x125   : > { %v1424_v50 = vrot.slane %v1423_v48, 1  ;;  %v1595_v51 = vrot.slane %v1594_v49, 1 }
 0x127   : > { %v1425_v52 = vadd.f32 %v1424_v50, %v1423_v48  ;;  %v1596_v53 = vadd.f32 %v1595_v51, %v1594_v49 }
 0x129   : > { %v1426_v54 = vmul.f32 0.015625, %v1425_v52  ;;  %v1597_v55 = vmul.f32 0.015625, %v1596_v53 }
 0x12b   : > { %1863 = vst [vmem:[%s2517_s11 + $0x6] sm:$0x1] %v1426_v54  ;;  %1889 = vst [vmem:[%s2517_s11 + $0x7] sm:$0x1] %v1597_v55 }
 0x12c PF: > { %s15_s15 = sadd.s32 1, %s2164_s15  }
 0x12d   : > { %p12_p4 = scmp.ge.s32.totalorder %s15_s15, 4  }
 0x12f   :  { %14 = sbr.rel (!%p12_p4) target bundleno = 1 (0x1), region = 95 }

</bundles_post_ra>
